<compile_context>
chip_gen: v7x
topology: tpu7x:2x2x1
jax: 0.10.0
libtpu: 0.0.40
codegen_flags: <defaults>
</compile_context>

<pallas_src>
import jax
import jax.numpy as jnp
import numpy as np
from jax.experimental import pallas as pl
from jax.experimental.pallas import tpu as pltpu


# ------------------------------ Pallas kernel ------------------------------ #
def _selfattn_kernel(x_ref, wqk_ref, bqk_ref, wv_ref, bv_ref, wn_ref, bn_ref,
                     pt_ref, cnt_ref, gamma_ref, out_ref, nxt_ref):
    x = x_ref[...]                                    # (C, HW) f32, channels-first
    x_bf = x.astype(jnp.bfloat16)                     # single bf16 cast, reused

    # ---- fused q/k projection (one MXU pass) + value projection ---------- #
    # qk = [Wq; Wk] @ x + [bq; bk]      -> (2*Cq, HW), f32 accumulation
    qk = jnp.dot(wqk_ref[...], x_bf,
                 preferred_element_type=jnp.float32) + bqk_ref[...]
    cq = wqk_ref.shape[0] // 2
    q = qk[:cq].astype(jnp.bfloat16)                  # (Cq, HW) bf16
    k = qk[cq:].astype(jnp.bfloat16)                  # (Cq, HW) bf16
    v = jnp.dot(wv_ref[...], x_bf,
                preferred_element_type=jnp.float32) + bv_ref[...]   # (C, HW)

    # ---- attention -------------------------------------------------------- #
    # energy[i, j] = <q[:, i], k[:, j]>  (TN matmul, bf16 operands, f32 acc)
    energy = jax.lax.dot_general(q, k, (((0,), (0,)), ((), ())),
                                 preferred_element_type=jnp.float32)  # (HW, HW)
    m = jnp.max(energy, axis=-1, keepdims=True)
    p = jnp.exp(energy - m)                           # f32 exp (v5e-safe)
    p = p * pl.reciprocal(jnp.sum(p, axis=-1, keepdims=True), approx=True)

    # o[c, i] = sum_j v[c, j] * p[i, j]   (NT matmul, bf16 operands, f32 acc)
    o = jax.lax.dot_general(v.astype(jnp.bfloat16), p.astype(jnp.bfloat16),
                            (((1,), (1,)), ((), ())),
                            preferred_element_type=jnp.float32)       # (C, HW)

    out = gamma_ref[0] * o + x                        # residual + gamma
    out_ref[...] = out                                # lane-dense (C, HW) store

    # ---- next: AvgPool2d(3,2,1) folded BEFORE the 1x1 conv (C -> 2C) ------ #
    #   nxt = (Wn @ (out @ P^T) + bn * counts) / 9     (count_include_pad=True)
    s = jnp.dot(out.astype(jnp.bfloat16), pt_ref[...],
                preferred_element_type=jnp.float32)                   # (C, HoWo)
    nxt = jnp.dot(wn_ref[...], s.astype(jnp.bfloat16),
                  preferred_element_type=jnp.float32)                 # (2C, HoWo)
    nxt_ref[...] = (nxt + bn_ref[...] * cnt_ref[...]) * (1.0 / 9.0)


# ------------------------------- JAX wrapper -------------------------------- #
def _avgpool3s2p1_tables(H, W):
    """P^T (H*W, Ho*Wo) 0/1 matrix and per-window in-bounds counts (1, Ho*Wo)
    such that AvgPool2d(3,2,1)(y) == (y @ P^T) / 9 with count_include_pad=True
    bias handled via counts."""
    Ho = (H - 1) // 2 + 1
    Wo = (W - 1) // 2 + 1
    PT = np.zeros((H * W, Ho * Wo), np.float32)
    cnt = np.zeros((1, Ho * Wo), np.float32)
    for io in range(Ho):
        for jo in range(Wo):
            o = io * Wo + jo
            c = 0
            for dy in range(3):
                for dx in range(3):
                    i = 2 * io - 1 + dy
                    j = 2 * jo - 1 + dx
                    if 0 <= i < H and 0 <= j < W:
                        PT[i * W + j, o] = 1.0
                        c += 1
            cnt[0, o] = c
    return PT, cnt


def selfattn_forward(x_nchw, params):
    N, C, H, W = x_nchw.shape
    HW = H * W
    Cq = C // 8
    Ho = (H - 1) // 2 + 1
    Wo = (W - 1) // 2 + 1
    HoWo = Ho * Wo

    # Channels-first flatten: pure reshape (no transpose, no HBM relayout).
    x_flat = x_nchw.reshape(N, C, HW).astype(jnp.float32)

    # Conv 1x1 weights used directly as (Cout, Cin) matmul operands (bf16).
    wqk = jnp.concatenate([params["wq"].reshape(Cq, C),
                           params["wk"].reshape(Cq, C)], axis=0).astype(jnp.bfloat16)
    bqk = jnp.concatenate([params["bq"], params["bk"]]).reshape(2 * Cq, 1).astype(jnp.float32)
    wv = params["wv"].reshape(C, C).astype(jnp.bfloat16)
    bv = params["bv"].reshape(C, 1).astype(jnp.float32)
    wn = params["wn"].reshape(2 * C, C).astype(jnp.bfloat16)
    bn = params["bn"].reshape(2 * C, 1).astype(jnp.float32)
    gamma = params["gamma"].reshape(1).astype(jnp.float32)           # SMEM scalar

    pt_np, cnt_np = _avgpool3s2p1_tables(H, W)
    pool_t = jnp.asarray(pt_np, jnp.bfloat16)                        # (HW, HoWo) 0/1
    counts = jnp.asarray(cnt_np, jnp.float32)                        # (1, HoWo)

    out_flat, nxt_flat = pl.pallas_call(
        _selfattn_kernel,
        out_shape=(
            jax.ShapeDtypeStruct((N, C, HW), jnp.float32),
            jax.ShapeDtypeStruct((N, 2 * C, HoWo), jnp.float32),
        ),
        grid=(N,),
        in_specs=[
            pl.BlockSpec((None, C, HW), lambda n: (n, 0, 0)),        # x (channels-first)
            pl.BlockSpec((2 * Cq, C), lambda n: (0, 0)),             # Wqk fused
            pl.BlockSpec((2 * Cq, 1), lambda n: (0, 0)),             # bqk
            pl.BlockSpec((C, C), lambda n: (0, 0)),                  # Wv
            pl.BlockSpec((C, 1), lambda n: (0, 0)),                  # bv
            pl.BlockSpec((2 * C, C), lambda n: (0, 0)),              # Wn
            pl.BlockSpec((2 * C, 1), lambda n: (0, 0)),              # bn
            pl.BlockSpec((HW, HoWo), lambda n: (0, 0)),              # P^T pooling matrix
            pl.BlockSpec((1, HoWo), lambda n: (0, 0)),               # window counts
            pl.BlockSpec(memory_space=pltpu.MemorySpace.SMEM),       # gamma scalar
        ],
        out_specs=(
            pl.BlockSpec((None, C, HW), lambda n: (n, 0, 0)),
            pl.BlockSpec((None, 2 * C, HoWo), lambda n: (n, 0, 0)),
        ),
        compiler_params=pltpu.CompilerParams(dimension_semantics=("parallel",)),
    )(x_flat, wqk, bqk, wv, bv, wn, bn, pool_t, counts, gamma)

    # Channels-first results: plain reshapes back to NCHW (free).
    out = out_flat.reshape(N, C, H, W)
    out_next = nxt_flat.reshape(N, 2 * C, Ho, Wo)
    return out, out_next


# ---------------------------- pure-JAX reference ----------------------------- #
def _reference_forward(x, params):
    N, C, H, W = x.shape
    HW = H * W

    def conv1x1(inp, w, b):
        wm = w.reshape(w.shape[0], w.shape[1])                      # (Cout, Cin)
        return jnp.einsum("nchw,oc->nohw", inp, wm) + b.reshape(1, -1, 1, 1)

    q = conv1x1(x, params["wq"], params["bq"]).reshape(N, -1, HW)   # (N, Cq, HW)
    k = conv1x1(x, params["wk"], params["bk"]).reshape(N, -1, HW)   # (N, Cq, HW)
    v = conv1x1(x, params["wv"], params["bv"]).reshape(N, C, HW)    # (N, C,  HW)

    energy = jnp.einsum("nci,ncj->nij", q, k)                       # (N, HW, HW)
    attn = jax.nn.softmax(energy, axis=-1)
    o = jnp.einsum("ncj,nij->nci", v, attn).reshape(N, C, H, W)
    out = params["gamma"] * o + x

    nxt = conv1x1(out, params["wn"], params["bn"])                  # (N, 2C, H, W)
    nxt_p = jnp.pad(nxt, ((0, 0), (0, 0), (1, 1), (1, 1)))
    pooled = jax.lax.reduce_window(nxt_p, 0.0, jax.lax.add,
                                   (1, 1, 3, 3), (1, 1, 2, 2), "VALID") / 9.0
    return out, pooled


# ----------------------------------- main ------------------------------------ #
if __name__ == "__main__":
    key = jax.random.PRNGKey(0)
    # in_channels must be a multiple of 8 (query/key use C//8 channels);
    # C=64, H=W=16 -> HW=256 keeps everything nicely (8,128)-tiled.
    N, C, H, W = 2, 64, 16, 16
    Cq = C // 8
    ks = jax.random.split(key, 10)

    x = jax.random.normal(ks[0], (N, C, H, W), jnp.float32)
    params = {
        "wq": 0.1 * jax.random.normal(ks[1], (Cq, C, 1, 1), jnp.float32),
        "bq": 0.1 * jax.random.normal(ks[2], (Cq,), jnp.float32),
        "wk": 0.1 * jax.random.normal(ks[3], (Cq, C, 1, 1), jnp.float32),
        "bk": 0.1 * jax.random.normal(ks[4], (Cq,), jnp.float32),
        "wv": 0.1 * jax.random.normal(ks[5], (C, C, 1, 1), jnp.float32),
        "bv": 0.1 * jax.random.normal(ks[6], (C,), jnp.float32),
        # torch init is zeros(1); use a nonzero gamma so the attention path
        # actually contributes to the checked output.
        "gamma": jnp.asarray([0.5], jnp.float32),
        "wn": 0.1 * jax.random.normal(ks[7], (2 * C, C, 1, 1), jnp.float32),
        "bn": 0.1 * jax.random.normal(ks[8], (2 * C,), jnp.float32),
    }

    out, out_next = jax.block_until_ready(jax.jit(selfattn_forward)(x, params))
    Ho = (H - 1) // 2 + 1
    Wo = (W - 1) // 2 + 1
    assert out.shape == (N, C, H, W) and out.dtype == jnp.float32
    assert out_next.shape == (N, 2 * C, Ho, Wo) and out_next.dtype == jnp.float32

    ref_out, ref_next = jax.block_until_ready(jax.jit(_reference_forward)(x, params))
    np.testing.assert_allclose(np.asarray(out), np.asarray(ref_out),
                               rtol=1e-2, atol=1e-2)
    np.testing.assert_allclose(np.asarray(out_next), np.asarray(ref_next),
                               rtol=1e-2, atol=1e-2)

    print("KERNEL_OK")
</pallas_src>

<mosaic_0001>
module attributes {stable_mosaic.version = 11 : i64} {
  func.func @_selfattn_kernel(%arg0: i32, %arg1: memref<1x64x256xf32, #tpu.memory_space<vmem>>, %arg2: memref<16x64xbf16, #tpu.memory_space<vmem>>, %arg3: memref<16x1xf32, #tpu.memory_space<vmem>>, %arg4: memref<64x64xbf16, #tpu.memory_space<vmem>>, %arg5: memref<64x1xf32, #tpu.memory_space<vmem>>, %arg6: memref<128x64xbf16, #tpu.memory_space<vmem>>, %arg7: memref<128x1xf32, #tpu.memory_space<vmem>>, %arg8: memref<256x64xbf16, #tpu.memory_space<vmem>>, %arg9: memref<1x64xf32, #tpu.memory_space<vmem>>, %arg10: memref<1xf32, #tpu.memory_space<smem>>, %arg11: memref<1x64x256xf32, #tpu.memory_space<vmem>>, %arg12: memref<1x128x64xf32, #tpu.memory_space<vmem>>) attributes {dimension_semantics = [#tpu.dimension_semantics<parallel>], iteration_bounds = array<i64: 2>, scalar_prefetch = 0 : i64, scratch_operands = 0 : i64, tpu.core_type = #tpu.core_type<tc>, window_params = [{transform_indices = @transform_0, window_bounds = array<i64: 1, 64, 256>}, {pipeline_mode = #tpu.pipeline_mode<synchronous>, transform_indices = @transform_1, window_bounds = array<i64: 16, 64>}, {pipeline_mode = #tpu.pipeline_mode<synchronous>, transform_indices = @transform_2, window_bounds = array<i64: 16, 1>}, {pipeline_mode = #tpu.pipeline_mode<synchronous>, transform_indices = @transform_3, window_bounds = array<i64: 64, 64>}, {pipeline_mode = #tpu.pipeline_mode<synchronous>, transform_indices = @transform_4, window_bounds = array<i64: 64, 1>}, {pipeline_mode = #tpu.pipeline_mode<synchronous>, transform_indices = @transform_5, window_bounds = array<i64: 128, 64>}, {pipeline_mode = #tpu.pipeline_mode<synchronous>, transform_indices = @transform_6, window_bounds = array<i64: 128, 1>}, {pipeline_mode = #tpu.pipeline_mode<synchronous>, transform_indices = @transform_7, window_bounds = array<i64: 256, 64>}, {pipeline_mode = #tpu.pipeline_mode<synchronous>, transform_indices = @transform_8, window_bounds = array<i64: 1, 64>}, {transform_indices = @transform_9, window_bounds = array<i64: 1>}, {transform_indices = @transform_10, window_bounds = array<i64: 1, 64, 256>}, {transform_indices = @transform_11, window_bounds = array<i64: 1, 128, 64>}]} {
    %c0 = arith.constant 0 : index
    %c0_0 = arith.constant 0 : index
    %c0_1 = arith.constant 0 : index
    %0 = vector.load %arg1[%c0, %c0_0, %c0_1] : memref<1x64x256xf32, #tpu.memory_space<vmem>>, vector<1x64x256xf32>
    %1 = vector.shape_cast %0 : vector<1x64x256xf32> to vector<64x256xf32>
    %2 = arith.truncf %1 : vector<64x256xf32> to vector<64x256xbf16>
    %c0_2 = arith.constant 0 : index
    %c0_3 = arith.constant 0 : index
    %3 = vector.load %arg2[%c0_2, %c0_3] : memref<16x64xbf16, #tpu.memory_space<vmem>>, vector<16x64xbf16>
    %cst = arith.constant dense<0.000000e+00> : vector<16x256xf32>
    %4 = tpu.matmul %3, %2, %cst {dimension_numbers = #tpu.dot_dimension_numbers<[1], [0], [0], [1], [0, 0, 1, 1], [], []>} : vector<16x64xbf16>, vector<64x256xbf16>, vector<16x256xf32> -> vector<16x256xf32>
    %c0_4 = arith.constant 0 : index
    %c0_5 = arith.constant 0 : index
    %5 = vector.load %arg3[%c0_4, %c0_5] : memref<16x1xf32, #tpu.memory_space<vmem>>, vector<16x1xf32>
    %6 = vector.broadcast %5 : vector<16x1xf32> to vector<16x256xf32>
    %7 = arith.addf %4, %6 : vector<16x256xf32>
    %8 = vector.extract_strided_slice %7 {offsets = [0, 0], sizes = [8, 256], strides = [1, 1]} : vector<16x256xf32> to vector<8x256xf32>
    %9 = arith.truncf %8 : vector<8x256xf32> to vector<8x256xbf16>
    %10 = vector.extract_strided_slice %7 {offsets = [8, 0], sizes = [8, 256], strides = [1, 1]} : vector<16x256xf32> to vector<8x256xf32>
    %11 = arith.truncf %10 : vector<8x256xf32> to vector<8x256xbf16>
    %c0_6 = arith.constant 0 : index
    %c0_7 = arith.constant 0 : index
    %12 = vector.load %arg4[%c0_6, %c0_7] : memref<64x64xbf16, #tpu.memory_space<vmem>>, vector<64x64xbf16>
    %cst_8 = arith.constant dense<0.000000e+00> : vector<64x256xf32>
    %13 = tpu.matmul %12, %2, %cst_8 {dimension_numbers = #tpu.dot_dimension_numbers<[1], [0], [0], [1], [0, 0, 1, 1], [], []>} : vector<64x64xbf16>, vector<64x256xbf16>, vector<64x256xf32> -> vector<64x256xf32>
    %c0_9 = arith.constant 0 : index
    %c0_10 = arith.constant 0 : index
    %14 = vector.load %arg5[%c0_9, %c0_10] : memref<64x1xf32, #tpu.memory_space<vmem>>, vector<64x1xf32>
    %15 = vector.broadcast %14 : vector<64x1xf32> to vector<64x256xf32>
    %16 = arith.addf %13, %15 : vector<64x256xf32>
    %cst_11 = arith.constant dense<0.000000e+00> : vector<256x256xf32>
    %17 = tpu.matmul %9, %11, %cst_11 {dimension_numbers = #tpu.dot_dimension_numbers<[0], [0], [1], [1], [0, 1, 1, 1], [], []>} : vector<8x256xbf16>, vector<8x256xbf16>, vector<256x256xf32> -> vector<256x256xf32>
    %cst_12 = arith.constant dense<0xFF800000> : vector<256xf32>
    %18 = vector.multi_reduction <maximumf>, %17, %cst_12 [1] : vector<256x256xf32> to vector<256xf32>
    %19 = vector.shape_cast %18 : vector<256xf32> to vector<256x1xf32>
    %20 = vector.broadcast %19 : vector<256x1xf32> to vector<256x256xf32>
    %21 = arith.subf %17, %20 : vector<256x256xf32>
    %22 = math.exp %21 : vector<256x256xf32>
    %cst_13 = arith.constant dense<0.000000e+00> : vector<256xf32>
    %23 = vector.multi_reduction <add>, %22, %cst_13 [1] : vector<256x256xf32> to vector<256xf32>
    %24 = vector.shape_cast %23 : vector<256xf32> to vector<256x1xf32>
    %25 = tpu.reciprocal %24 {approx = true} : vector<256x1xf32> -> vector<256x1xf32>
    %26 = vector.broadcast %25 : vector<256x1xf32> to vector<256x256xf32>
    %27 = arith.mulf %22, %26 : vector<256x256xf32>
    %28 = arith.truncf %16 : vector<64x256xf32> to vector<64x256xbf16>
    %29 = arith.truncf %27 : vector<256x256xf32> to vector<256x256xbf16>
    %cst_14 = arith.constant dense<0.000000e+00> : vector<64x256xf32>
    %30 = tpu.matmul %28, %29, %cst_14 {dimension_numbers = #tpu.dot_dimension_numbers<[1], [1], [0], [0], [0, 0, 1, 0], [], []>} : vector<64x256xbf16>, vector<256x256xbf16>, vector<64x256xf32> -> vector<64x256xf32>
    %c0_15 = arith.constant 0 : index
    %31 = memref.load %arg10[%c0_15] : memref<1xf32, #tpu.memory_space<smem>>
    %32 = vector.broadcast %31 : f32 to vector<64x256xf32>
    %33 = arith.mulf %32, %30 : vector<64x256xf32>
    %34 = arith.addf %33, %1 : vector<64x256xf32>
    %c0_16 = arith.constant 0 : index
    %c0_17 = arith.constant 0 : index
    %c0_18 = arith.constant 0 : index
    %35 = vector.load %arg11[%c0_16, %c0_17, %c0_18] : memref<1x64x256xf32, #tpu.memory_space<vmem>>, vector<1x64x256xf32>
    %36 = vector.shape_cast %35 : vector<1x64x256xf32> to vector<64x256xf32>
    %37 = vector.shape_cast %34 : vector<64x256xf32> to vector<1x64x256xf32>
    tpu.vector_store %arg11[%c0_16, %c0_17, %c0_18], %37 {strides = array<i32>} : memref<1x64x256xf32, #tpu.memory_space<vmem>>, vector<1x64x256xf32>,
    %38 = arith.truncf %34 : vector<64x256xf32> to vector<64x256xbf16>
    %c0_19 = arith.constant 0 : index
    %c0_20 = arith.constant 0 : index
    %39 = vector.load %arg8[%c0_19, %c0_20] : memref<256x64xbf16, #tpu.memory_space<vmem>>, vector<256x64xbf16>
    %cst_21 = arith.constant dense<0.000000e+00> : vector<64x64xf32>
    %40 = tpu.matmul %38, %39, %cst_21 {dimension_numbers = #tpu.dot_dimension_numbers<[1], [0], [0], [1], [0, 0, 1, 1], [], []>} : vector<64x256xbf16>, vector<256x64xbf16>, vector<64x64xf32> -> vector<64x64xf32>
    %c0_22 = arith.constant 0 : index
    %c0_23 = arith.constant 0 : index
    %41 = vector.load %arg6[%c0_22, %c0_23] : memref<128x64xbf16, #tpu.memory_space<vmem>>, vector<128x64xbf16>
    %42 = arith.truncf %40 : vector<64x64xf32> to vector<64x64xbf16>
    %cst_24 = arith.constant dense<0.000000e+00> : vector<128x64xf32>
    %43 = tpu.matmul %41, %42, %cst_24 {dimension_numbers = #tpu.dot_dimension_numbers<[1], [0], [0], [1], [0, 0, 1, 1], [], []>} : vector<128x64xbf16>, vector<64x64xbf16>, vector<128x64xf32> -> vector<128x64xf32>
    %c0_25 = arith.constant 0 : index
    %c0_26 = arith.constant 0 : index
    %44 = vector.load %arg7[%c0_25, %c0_26] : memref<128x1xf32, #tpu.memory_space<vmem>>, vector<128x1xf32>
    %c0_27 = arith.constant 0 : index
    %c0_28 = arith.constant 0 : index
    %45 = vector.load %arg9[%c0_27, %c0_28] : memref<1x64xf32, #tpu.memory_space<vmem>>, vector<1x64xf32>
    %46 = vector.broadcast %44 : vector<128x1xf32> to vector<128x64xf32>
    %47 = vector.broadcast %45 : vector<1x64xf32> to vector<128x64xf32>
    %48 = arith.mulf %46, %47 : vector<128x64xf32>
    %49 = arith.addf %43, %48 : vector<128x64xf32>
    %cst_29 = arith.constant 0.111111112 : f32
    %50 = vector.broadcast %cst_29 : f32 to vector<128x64xf32>
    %51 = arith.mulf %49, %50 : vector<128x64xf32>
    %c0_30 = arith.constant 0 : index
    %c0_31 = arith.constant 0 : index
    %c0_32 = arith.constant 0 : index
    %52 = vector.load %arg12[%c0_30, %c0_31, %c0_32] : memref<1x128x64xf32, #tpu.memory_space<vmem>>, vector<1x128x64xf32>
    %53 = vector.shape_cast %52 : vector<1x128x64xf32> to vector<128x64xf32>
    %54 = vector.shape_cast %51 : vector<128x64xf32> to vector<1x128x64xf32>
    tpu.vector_store %arg12[%c0_30, %c0_31, %c0_32], %54 {strides = array<i32>} : memref<1x128x64xf32, #tpu.memory_space<vmem>>, vector<1x128x64xf32>,
    return
  }
  func.func @transform_0(%arg0: i32) -> (i32, i32, i32) {
    %c0_i32 = arith.constant 0 : i32
    %c0_i32_0 = arith.constant 0 : i32
    %c0_i32_1 = arith.constant 0 : i32
    return %arg0, %c0_i32, %c0_i32_0 : i32, i32, i32
  }
  func.func @transform_1(%arg0: i32) -> (i32, i32) {
    %c0_i32 = arith.constant 0 : i32
    %c0_i32_0 = arith.constant 0 : i32
    %c0_i32_1 = arith.constant 0 : i32
    return %c0_i32, %c0_i32_0 : i32, i32
  }
  func.func @transform_2(%arg0: i32) -> (i32, i32) {
    %c0_i32 = arith.constant 0 : i32
    %c0_i32_0 = arith.constant 0 : i32
    %c0_i32_1 = arith.constant 0 : i32
    return %c0_i32, %c0_i32_0 : i32, i32
  }
  func.func @transform_3(%arg0: i32) -> (i32, i32) {
    %c0_i32 = arith.constant 0 : i32
    %c0_i32_0 = arith.constant 0 : i32
    %c0_i32_1 = arith.constant 0 : i32
    return %c0_i32, %c0_i32_0 : i32, i32
  }
  func.func @transform_4(%arg0: i32) -> (i32, i32) {
    %c0_i32 = arith.constant 0 : i32
    %c0_i32_0 = arith.constant 0 : i32
    %c0_i32_1 = arith.constant 0 : i32
    return %c0_i32, %c0_i32_0 : i32, i32
  }
  func.func @transform_5(%arg0: i32) -> (i32, i32) {
    %c0_i32 = arith.constant 0 : i32
    %c0_i32_0 = arith.constant 0 : i32
    %c0_i32_1 = arith.constant 0 : i32
    return %c0_i32, %c0_i32_0 : i32, i32
  }
  func.func @transform_6(%arg0: i32) -> (i32, i32) {
    %c0_i32 = arith.constant 0 : i32
    %c0_i32_0 = arith.constant 0 : i32
    %c0_i32_1 = arith.constant 0 : i32
    return %c0_i32, %c0_i32_0 : i32, i32
  }
  func.func @transform_7(%arg0: i32) -> (i32, i32) {
    %c0_i32 = arith.constant 0 : i32
    %c0_i32_0 = arith.constant 0 : i32
    %c0_i32_1 = arith.constant 0 : i32
    return %c0_i32, %c0_i32_0 : i32, i32
  }
  func.func @transform_8(%arg0: i32) -> (i32, i32) {
    %c0_i32 = arith.constant 0 : i32
    %c0_i32_0 = arith.constant 0 : i32
    %c0_i32_1 = arith.constant 0 : i32
    return %c0_i32, %c0_i32_0 : i32, i32
  }
  func.func @transform_9(%arg0: i32) -> i32 {
    %c0_i32 = arith.constant 0 : i32
    %c0_i32_0 = arith.constant 0 : i32
    return %c0_i32 : i32
  }
  func.func @transform_10(%arg0: i32) -> (i32, i32, i32) {
    %c0_i32 = arith.constant 0 : i32
    %c0_i32_0 = arith.constant 0 : i32
    %c0_i32_1 = arith.constant 0 : i32
    return %arg0, %c0_i32, %c0_i32_0 : i32, i32, i32
  }
  func.func @transform_11(%arg0: i32) -> (i32, i32, i32) {
    %c0_i32 = arith.constant 0 : i32
    %c0_i32_0 = arith.constant 0 : i32
    %c0_i32_1 = arith.constant 0 : i32
    return %arg0, %c0_i32, %c0_i32_0 : i32, i32, i32
  }
}

</mosaic_0001>

<bundles_post_ra>
// kernel: selfattn_forward.1
= control target key start
LH: loop header
LB: loop body
LE: loop exit
PB: predicated region body
PF: predicated region fallthrough
CT: control target
= control target key end

     0   :  { %s2682_s19 = smov 0   ;;  %s3634_s0 = inlined_call_operand.vmem [shape: f32[2,64,256], index: 0, kind: input, shape index: {}]   ;;  %s3635_s1 = inlined_call_operand.vmem [shape: bf16[16,64], index: 1, kind: input, shape index: {}]   ;;  %s3636_s2 = inlined_call_operand.vmem [shape: f32[16,1], index: 2, kind: input, shape index: {}]   ;;  %s3637_s3 = inlined_call_operand.vmem [shape: bf16[64,64], index: 3, kind: input, shape index: {}]   ;;  %s3638_s4 = inlined_call_operand.vmem [shape: f32[64,1], index: 4, kind: input, shape index: {}]   ;;  %s3639_s5 = inlined_call_operand.vmem [shape: bf16[128,64], index: 5, kind: input, shape index: {}]   ;;  %s3640_s6 = inlined_call_operand.vmem [shape: f32[128,1], index: 6, kind: input, shape index: {}]   ;;  %s3641_s7 = inlined_call_operand.vmem [shape: bf16[256,64], index: 7, kind: input, shape index: {}]   ;;  %s3642_s8 = inlined_call_operand.vmem [shape: f32[1,64], index: 8, kind: input, shape index: {}]   ;;  %s3643_s9 = inlined_call_operand.<no memory space> [shape: f32[1], index: 9, kind: input, shape index: {}]   ;;  %s3644_s10 = inlined_call_operand.vmem [shape: f32[2,64,256], index: 10, kind: output, shape index: {0}]   ;;  %s3645_s11 = inlined_call_operand.vmem [shape: f32[2,128,64], index: 11, kind: output, shape index: {1}]  }
   0x1   :  { %17 = sst [smem:[#allocation2]] %s3643_s9 }
   0x2 LB: > { %s2202_s20 = sadd.s32 4294967295, %s2616_s19   ;;  %p2206_p0 = scmp.ge.s32.totalorder %s2616_s19, 1  ;;  %s2616_s19 = sphi %s2682_s19, %s23_s19  }
   0x3   : > { %p341_p1 = scmp.lt.s32.totalorder %s2616_s19, 3 }
   0x5   : > { %p342_p2 = pnand %p2206_p0, %p341_p1 }
   0x7   : > { %345 = sbr.rel (%p342_p2) target bundleno = 1831 (0x727), region = 60 }
   0xe   : > { %p386_p3 = scmp.lt.s32.totalorder %s2202_s20, 1  ;;  %v3646_v0 = vmov 0   ;;  %v428_v1 = vld [vmem:[%s3636_s2] sm:$0xff]  ;;  %v429_v2 = vld [vmem:[%s3636_s2 + $0x8] sm:$0xff]  ;;  %vm445_vm0 = vcmask 523264   ;;  %vm738_vm1 = vcmask 1043456  }
   0xf   : > { %481 = vmatprep.mubr.bf16.mxu0 %v3646_v0  ;;  %2371 = vset.pattern.permute.xlu0 %v3646_v0  ;;  %v2373_v27 = vld [vmem:[%s3635_s1] sm:$0xff]   ;;  %vm689_vm2 = vcmask 64512   ;;  %s1531_s14 = sld [smem:[#allocation2]] }
  0x10   : > { %s3735_s20 = smov (!%p386_p3, %s2202_s20), 1  ;;  %432 = vperm.xlu0 %2371, %v428_v1   ;;  %616 = vmatprep.mubr.bf16.mxu1 %v3646_v0 }
  0x11   : > { %s2699_s24 = sshll.u32 %s3735_s20, 7 }
  0x12   : > { %s2705_s27 = scalar_lea.vmem %s3634_s0, %s2699_s24  ;;  %s3491_s17 = scalar_lea.vmem %s3644_s10, %s2699_s24 }
  0x13   : > { %v403_v3 = vld [vmem:[%s2705_s27 + $0x8] sm:$0xff]  ;;  %v405_v4 = vld [vmem:[%s2705_s27 + $0x18] sm:$0xff]  ;;  %v402_v5 = vld [vmem:[%s2705_s27] sm:$0xff]  ;;  %s3589_s9 = scalar_lea.vmem %s3645_s11, %s2699_s24 }
  0x14   : > { %437 = vperm.xlu0 %2371, %v429_v2   ;;  %v419_v6 = vpack.c.bf16 %v405_v4, %v403_v3  ;;  %v404_v7 = vld [vmem:[%s2705_s27 + $0x10] sm:$0xff]  ;;  %v407_v8 = vld [vmem:[%s2705_s27 + $0x28] sm:$0xff]  ;;  %v409_v9 = vld [vmem:[%s2705_s27 + $0x38] sm:$0xff] }
  0x15   : > { %v418_v10 = vpack.c.bf16 %v404_v7, %v402_v5  ;;  %v421_v11 = vpack.c.bf16 %v409_v9, %v407_v8  ;;  %v406_v12 = vld [vmem:[%s2705_s27 + $0x20] sm:$0xff]  ;;  %v408_v13 = vld [vmem:[%s2705_s27 + $0x30] sm:$0xff]  ;;  %v411_v14 = vld [vmem:[%s2705_s27 + $0x48] sm:$0xff] }
  0x16   : > { %449 = vmatprep.subr.bf16.mxu0 %v419_v6  ;;  %v413_v15 = vld [vmem:[%s2705_s27 + $0x58] sm:$0xff]  ;;  %584 = vmatprep.subr.bf16.mxu1 %v419_v6  ;;  %v420_v16 = vpack.c.bf16 %v408_v13, %v406_v12  ;;  %v410_v17 = vld [vmem:[%s2705_s27 + $0x40] sm:$0xff]  ;;  %v412_v18 = vld [vmem:[%s2705_s27 + $0x50] sm:$0xff] }
  0x17   : > { %450 = vmatpush1.bf16.msra.mxu0 %v418_v10  ;;  %v415_v19 = vld [vmem:[%s2705_s27 + $0x68] sm:$0xff]  ;;  %585 = vmatpush1.bf16.msra.mxu1 %v418_v10  ;;  %v423_v20 = vpack.c.bf16 %v413_v15, %v411_v14  ;;  %v417_v21 = vld [vmem:[%s2705_s27 + $0x78] sm:$0xff]  ;;  %v414_v22 = vld [vmem:[%s2705_s27 + $0x60] sm:$0xff]  ;;  %v422_v24 = vpack.c.bf16 %v412_v18, %v410_v17 }
  0x18   : > { %451 = vmatprep.subr.bf16.mxu0 %v421_v11  ;;  %586 = vmatprep.subr.bf16.mxu1 %v421_v11  ;;  %v416_v23 = vld [vmem:[%s2705_s27 + $0x70] sm:$0xff]  ;;  %v425_v25 = vpack.c.bf16 %v417_v21, %v415_v19 }
  0x19   : > { %v424_v26 = vpack.c.bf16 %v416_v23, %v414_v22 }
  0x1b   : > { %452 = vmatpush1.bf16.msra.mxu0 %v420_v16  ;;  %587 = vmatpush1.bf16.msra.mxu1 %v420_v16 }
  0x1c   : > { %453 = vmatprep.subr.bf16.mxu0 %v423_v20  ;;  %588 = vmatprep.subr.bf16.mxu1 %v423_v20 }
  0x1f   : > { %454 = vmatpush1.bf16.msra.mxu0 %v422_v24  ;;  %589 = vmatpush1.bf16.msra.mxu1 %v422_v24 }
  0x20   : > { %455 = vmatprep.subr.bf16.mxu0 %v425_v25  ;;  %590 = vmatprep.subr.bf16.mxu1 %v425_v25 }
  0x23   : > { %456 = vmatpush1.bf16.msra.mxu0 %v424_v26  ;;  %591 = vmatpush1.bf16.msra.mxu1 %v424_v26 }
  0x26   : > { %2214 = vmatmul.mubr.msk.bf16.vlgmr.msra.gmra.mrb[0].mxu0 %vm445_vm0, %v2373_v27 }
  0x27   : > { %777 = vmatprep.mubr.bf16.mxu0 %v3646_v0 }
  0x8f   : > { %v433_v28 = vpop.permute.xlu0 %432 }
  0x93   : > { %v438_v32 = vpop.permute.xlu0 %437 }
  0xf9   : > { %v483_v29 = vpop.f32.mrb[0].mxu0 }
  0xfa   : > { %v485_v30 = vpop.f32.mrb[1].mxu0  ;;  %v484_v31 = vadd.f32 %v483_v29, %v433_v28 }
  0xfb   : > { %v487_v33 = vpop.f32.mrb[2].mxu0  ;;  %v486_v41 = vadd.f32 %v485_v30, %v433_v28 }
  0xfc   : > { %v488_v34 = vadd.f32 %v487_v33, %v438_v32  ;;  %v489_v35 = vpop.f32.mrb[3].mxu0  ;;  %v492_v36 = vpack.c.bf16 %v484_v31, %v484_v31 }
  0xfd   : > { %v490_v37 = vadd.f32 %v489_v35, %v438_v32  ;;  %v493_v42 = vpack.c.bf16 %v486_v41, %v486_v41 }
  0xfe   : > { %v494_v38 = vpack.c.bf16 %v488_v34, %v488_v34  ;;  %657 = vxpose.xlu1.c.b16.start.end [1/1] (short) %v492_v36, 128 }
  0xff   : > { %v495_v39 = vpack.c.bf16 %v490_v37, %v490_v37 }
 0x100   : > { %v740_v40 = vsel %vm738_vm1, %v494_v38, 0 }
 0x101   : > { %2223 = vmatprep.subr.msk.bf16.mxu0 %vm738_vm1, %v495_v39 }
 0x102   : > { %746 = vmatpush1.bf16.msra.mxu0 %v740_v40 }
 0x11b   : > { %673 = vxpose.xlu1.c.b16.start.end [1/1] (short) %v493_v42, 128 }
 0x11f   : > { %2372 = vset.pattern.permute.xlu1 %v3646_v0 }
 0x164   : > { %v665_v43 = vpop.trf.xlu1 }
 0x165   : > { %2224 = vmatmul.mubr.msk.bf16.vlgmr.msra.gmra.mrb[4].mxu0 %vm689_vm2, %v665_v43 }
 0x166   : > { %787 = vmatprep.mubr.bf16.mxu0 %v3646_v0 }
 0x168   : > { %v666_v44 = vpop.trf.xlu1 }
 0x16c   : > { %v667_v45 = vpop.trf.xlu1 }
 0x16d   : > { %2225 = vmatmul.mubr.msk.bf16.gmra.mrb[8].mxu0 %vm689_vm2, %v666_v44 }
 0x16e   : > { %797 = vmatprep.mubr.bf16.mxu0 %v3646_v0 }
 0x170   : > { %v668_v46 = vpop.trf.xlu1 }
 0x174   : > { %v669_v47 = vpop.trf.xlu1 }
 0x175   : > { %2226 = vmatmul.mubr.msk.bf16.gmra.mrb[12].mxu0 %vm689_vm2, %v667_v45 }
 0x176   : > { %807 = vmatprep.mubr.bf16.mxu0 %v3646_v0 }
 0x178   : > { %v670_v48 = vpop.trf.xlu1 }
 0x17c   : > { %v671_v49 = vpop.trf.xlu1 }
 0x17d   : > { %2227 = vmatmul.mubr.msk.bf16.gmra.mrb[16].mxu0 %vm689_vm2, %v668_v46 }
 0x17e   : > { %817 = vmatprep.mubr.bf16.mxu0 %v3646_v0 }
 0x180   : > { %v672_v50 = vpop.trf.xlu1 }
 0x184   : > { %v681_v51 = vpop.trf.xlu1 }
 0x185   : > { %2228 = vmatmul.mubr.msk.bf16.gmra.mrb[20].mxu0 %vm689_vm2, %v669_v47 }
 0x186   : > { %827 = vmatprep.mubr.bf16.mxu0 %v3646_v0 }
 0x188   : > { %v682_v52 = vpop.trf.xlu1 }
 0x18c   : > { %v683_v53 = vpop.trf.xlu1 }
 0x18d   : > { %2229 = vmatmul.mubr.msk.bf16.gmra.mrb[24].mxu0 %vm689_vm2, %v670_v48 }
 0x18e   : > { %837 = vmatprep.mubr.bf16.mxu0 %v3646_v0 }
 0x190   : > { %v684_v54 = vpop.trf.xlu1 }
 0x194   : > { %v685_v55 = vpop.trf.xlu1 }
 0x195   : > { %2230 = vmatmul.mubr.msk.bf16.gmra.mrb[28].mxu0 %vm689_vm2, %v671_v49 }
 0x196   : > { %847 = vmatprep.mubr.bf16.mxu0 %v3646_v0 }
 0x198   : > { %v686_v56 = vpop.trf.xlu1 }
 0x19c   : > { %v687_v57 = vpop.trf.xlu1 }
 0x19d   : > { %2231 = vmatmul.mubr.msk.bf16.gmra.mrb[32].mxu0 %vm689_vm2, %v672_v50 }
 0x19e   : > { %857 = vmatprep.mubr.bf16.mxu0 %v3646_v0 }
 0x1a0   : > { %v688_v58 = vpop.trf.xlu1 }
 0x1a5   : > { %2232 = vmatmul.mubr.msk.bf16.gmra.mrb[36].mxu0 %vm689_vm2, %v681_v51 }
 0x1a6   : > { %867 = vmatprep.mubr.bf16.mxu0 %v3646_v0 }
 0x1ad   : > { %2233 = vmatmul.mubr.msk.bf16.gmra.mrb[40].mxu0 %vm689_vm2, %v682_v52 }
 0x1ae   : > { %877 = vmatprep.mubr.bf16.mxu0 %v3646_v0 }
 0x1b5   : > { %2234 = vmatmul.mubr.msk.bf16.gmra.mrb[44].mxu0 %vm689_vm2, %v683_v53 }
 0x1b6   : > { %887 = vmatprep.mubr.bf16.mxu0 %v3646_v0 }
 0x1bd   : > { %2235 = vmatmul.mubr.msk.bf16.gmra.mrb[48].mxu0 %vm689_vm2, %v684_v54 }
 0x1be   : > { %897 = vmatprep.mubr.bf16.mxu0 %v3646_v0 }
 0x1c5   : > { %2236 = vmatmul.mubr.msk.bf16.gmra.mrb[52].mxu0 %vm689_vm2, %v685_v55 }
 0x1c6   : > { %907 = vmatprep.mubr.bf16.mxu0 %v3646_v0 }
 0x1cd   : > { %2237 = vmatmul.mubr.msk.bf16.gmra.mrb[56].mxu0 %vm689_vm2, %v686_v56 }
 0x1ce   : > { %917 = vmatprep.mubr.bf16.mxu0 %v3646_v0 }
 0x1d5   : > { %2238 = vmatmul.mubr.msk.bf16.gmra.mrb[60].mxu0 %vm689_vm2, %v687_v57 }
 0x1d6   : > { %927 = vmatprep.mubr.bf16.mxu0 %v3646_v0  ;;  %v3686_v0 = vmov 0  }
 0x1dd   : > { %2239 = vmatmul.mubr.msk.bf16.gmra.mrb[64].mxu0 %vm689_vm2, %v688_v58 }
 0x238   : > { %v2760_v59 = vpop.f32.mrb[4].mxu0 }
 0x239   : > { %v2762_v60 = vpop.f32.mrb[5].mxu0 }
 0x23a   : > { %v2764_v61 = vpop.f32.mrb[6].mxu0  ;;  %v938_v62 = vmax.f32 %v2760_v59, %v2762_v60 }
 0x23b   : > { %v2768_v63 = vpop.f32.mrb[7].mxu0 }
 0x23c   : > { %939 = vmax.xlane.f32.xlu0 %v938_v62  ;;  %v941_v1 = vmax.f32 %v2764_v61, %v2768_v63 }
 0x23e   : > { %942 = vmax.xlane.f32.xlu1 %v941_v1 }
 0x240   : > { %v2772_v2 = vpop.f32.mrb[8].mxu0 }
 0x241   : > { %v2774_v3 = vpop.f32.mrb[9].mxu0 }
 0x242   : > { %v2776_v4 = vpop.f32.mrb[10].mxu0  ;;  %v944_v5 = vmax.f32 %v2772_v2, %v2774_v3 }
 0x243   : > { %v2780_v6 = vpop.f32.mrb[11].mxu0 }
 0x244   : > { %945 = vmax.xlane.f32.xlu0 %v944_v5  ;;  %v947_v7 = vmax.f32 %v2776_v4, %v2780_v6 }
 0x248   : > { %948 = vmax.xlane.f32.xlu0 %v947_v7  ;;  %v2784_v8 = vpop.f32.mrb[12].mxu0 }
 0x249   : > { %v2786_v9 = vpop.f32.mrb[13].mxu0 }
 0x24a   : > { %v950_v10 = vmax.f32 %v2784_v8, %v2786_v9  ;;  %v2790_v11 = vpop.f32.mrb[14].mxu0 }
 0x24b   : > { %v2792_v12 = vpop.f32.mrb[15].mxu0 }
 0x24c   : > { %951 = vmax.xlane.f32.xlu0 %v950_v10  ;;  %v953_v13 = vmax.f32 %v2790_v11, %v2792_v12 }
 0x250   : > { %954 = vmax.xlane.f32.xlu0 %v953_v13  ;;  %v2796_v14 = vpop.f32.mrb[16].mxu0 }
 0x251   : > { %v2798_v15 = vpop.f32.mrb[17].mxu0 }
 0x252   : > { %v956_v16 = vmax.f32 %v2796_v14, %v2798_v15  ;;  %v2802_v17 = vpop.f32.mrb[18].mxu0 }
 0x253   : > { %v2804_v18 = vpop.f32.mrb[19].mxu0 }
 0x254   : > { %957 = vmax.xlane.f32.xlu0 %v956_v16  ;;  %v959_v19 = vmax.f32 %v2802_v17, %v2804_v18 }
 0x258   : > { %960 = vmax.xlane.f32.xlu0 %v959_v19  ;;  %v2808_v20 = vpop.f32.mrb[20].mxu0 }
 0x259   : > { %v2810_v21 = vpop.f32.mrb[21].mxu0 }
 0x25a   : > { %v962_v22 = vmax.f32 %v2808_v20, %v2810_v21  ;;  %v2814_v23 = vpop.f32.mrb[22].mxu0 }
 0x25b   : > { %v2816_v24 = vpop.f32.mrb[23].mxu0 }
 0x25c   : > { %963 = vmax.xlane.f32.xlu0 %v962_v22  ;;  %v965_v25 = vmax.f32 %v2814_v23, %v2816_v24 }
 0x260   : > { %966 = vmax.xlane.f32.xlu0 %v965_v25  ;;  %v2820_v26 = vpop.f32.mrb[24].mxu0 }
 0x261   : > { %v2822_v27 = vpop.f32.mrb[25].mxu0 }
 0x262   : > { %v2824_v28 = vpop.f32.mrb[26].mxu0  ;;  %v968_v29 = vmax.f32 %v2820_v26, %v2822_v27 }
 0x263   : > { %v2828_v30 = vpop.f32.mrb[27].mxu0 }
 0x264   : > { %969 = vmax.xlane.f32.xlu0 %v968_v29  ;;  %v971_v31 = vmax.f32 %v2824_v28, %v2828_v30 }
 0x266   : > { %972 = vmax.xlane.f32.xlu1 %v971_v31 }
 0x268   : > { %v2832_v32 = vpop.f32.mrb[28].mxu0 }
 0x269   : > { %v2834_v33 = vpop.f32.mrb[29].mxu0 }
 0x26a   : > { %v2836_v34 = vpop.f32.mrb[30].mxu0  ;;  %v974_v35 = vmax.f32 %v2832_v32, %v2834_v33 }
 0x26b   : > { %v2840_v36 = vpop.f32.mrb[31].mxu0 }
 0x26c   : > { %975 = vmax.xlane.f32.xlu0 %v974_v35  ;;  %v977_v37 = vmax.f32 %v2836_v34, %v2840_v36 }
 0x26e   : > { %978 = vmax.xlane.f32.xlu1 %v977_v37 }
 0x270   : > { %v2844_v38 = vpop.f32.mrb[32].mxu0 }
 0x271   : > { %v2846_v39 = vpop.f32.mrb[33].mxu0 }
 0x272   : > { %v2848_v40 = vpop.f32.mrb[34].mxu0  ;;  %v980_v41 = vmax.f32 %v2844_v38, %v2846_v39 }
 0x273   : > { %v2852_v42 = vpop.f32.mrb[35].mxu0 }
 0x274   : > { %981 = vmax.xlane.f32.xlu0 %v980_v41  ;;  %v983_v43 = vmax.f32 %v2848_v40, %v2852_v42 }
 0x276   : > { %984 = vmax.xlane.f32.xlu1 %v983_v43 }
 0x278   : > { %v2856_v44 = vpop.f32.mrb[36].mxu0 }
 0x279   : > { %v2858_v45 = vpop.f32.mrb[37].mxu0 }
 0x27a   : > { %v2860_v46 = vpop.f32.mrb[38].mxu0  ;;  %v986_v47 = vmax.f32 %v2856_v44, %v2858_v45 }
 0x27b   : > { %v2864_v48 = vpop.f32.mrb[39].mxu0 }
 0x27c   : > { %987 = vmax.xlane.f32.xlu0 %v986_v47  ;;  %v989_v49 = vmax.f32 %v2860_v46, %v2864_v48 }
 0x27e   : > { %990 = vmax.xlane.f32.xlu1 %v989_v49 }
 0x280   : > { %v2868_v50 = vpop.f32.mrb[40].mxu0 }
 0x281   : > { %v2870_v51 = vpop.f32.mrb[41].mxu0 }
 0x282   : > { %v2872_v52 = vpop.f32.mrb[42].mxu0  ;;  %v992_v53 = vmax.f32 %v2868_v50, %v2870_v51 }
 0x283   : > { %3674 = vst [vmem:[#allocation3_spill] sm:$0xff] %v2872_v52  ;;  %v2876_v54 = vpop.f32.mrb[43].mxu0 }
 0x284   : > { %3675 = vst [vmem:[#allocation4_spill] sm:$0xff] %v2876_v54  ;;  %993 = vmax.xlane.f32.xlu0 %v992_v53  ;;  %v995_v55 = vmax.f32 %v2872_v52, %v2876_v54  ;;  %v2376_v54 = vld [vmem:[%s3637_s3 + $0x10] sm:$0xff]  }
 0x286   : > { %996 = vmax.xlane.f32.xlu1 %v995_v55 }
 0x288   : > { %v2880_v56 = vpop.f32.mrb[44].mxu0 }
 0x289   : > { %3676 = vst [vmem:[#allocation5_spill] sm:$0xff] %v2880_v56  ;;  %v2882_v57 = vpop.f32.mrb[45].mxu0 }
 0x28a   : > { %3677 = vst [vmem:[#allocation6_spill] sm:$0xff] %v2882_v57  ;;  %v2884_v58 = vpop.f32.mrb[46].mxu0  ;;  %v998_v62 = vmax.f32 %v2880_v56, %v2882_v57 }
 0x28b   : > { %3678 = vst [vmem:[#allocation7_spill] sm:$0xff] %v2884_v58  ;;  %v2888_v1 = vpop.f32.mrb[47].mxu0 }
 0x28c   : > { %3679 = vst [vmem:[#allocation8_spill] sm:$0xff] %v2888_v1  ;;  %999 = vmax.xlane.f32.xlu0 %v998_v62  ;;  %v1001_v5 = vmax.f32 %v2884_v58, %v2888_v1 }
 0x28e   : > { %1002 = vmax.xlane.f32.xlu1 %v1001_v5 }
 0x290   : > { %v2892_v7 = vpop.f32.mrb[48].mxu0 }
 0x291   : > { %3680 = vst [vmem:[#allocation9_spill] sm:$0xff] %v2892_v7  ;;  %v2894_v10 = vpop.f32.mrb[49].mxu0 }
 0x292   : > { %3681 = vst [vmem:[#allocation10_spill] sm:$0xff] %v2894_v10  ;;  %v2896_v13 = vpop.f32.mrb[50].mxu0  ;;  %v1004_v16 = vmax.f32 %v2892_v7, %v2894_v10  ;;  %v2375_v10 = vld [vmem:[%s3637_s3 + $0x8] sm:$0xff]  }
 0x293   : > { %3682 = vst [vmem:[#allocation11_spill] sm:$0xff] %v2896_v13  ;;  %v2900_v19 = vpop.f32.mrb[51].mxu0 }
 0x294   : > { %3683 = vst [vmem:[#allocation12_spill] sm:$0xff] %v2900_v19  ;;  %1005 = vmax.xlane.f32.xlu0 %v1004_v16  ;;  %v1007_v22 = vmax.f32 %v2896_v13, %v2900_v19 }
 0x296   : > { %1008 = vmax.xlane.f32.xlu1 %v1007_v22 }
 0x298   : > { %v2904_v25 = vpop.f32.mrb[52].mxu0 }
 0x299   : > { %v2906_v29 = vpop.f32.mrb[53].mxu0 }
 0x29a   : > { %v2908_v31 = vpop.f32.mrb[54].mxu0 }
 0x29b   : > { %3684 = vst [vmem:[#allocation13_spill] sm:$0xff] %v2908_v31  ;;  %v2912_v37 = vpop.f32.mrb[55].mxu0 }
 0x29c   : > { %3685 = vst [vmem:[#allocation14_spill] sm:$0xff] %v2912_v37  ;;  %v1013_v41 = vmax.f32 %v2908_v31, %v2912_v37 }
 0x29e   : > { %1014 = vmax.xlane.f32.xlu1 %v1013_v41  ;;  %v2374_v41 = vld [vmem:[%s3637_s3] sm:$0xff]  }
 0x29f   : > { %2219 = vmatmul.mubr.msk.bf16.vlgmr.msra.gmra.mrb[0].mxu1 %vm445_vm0, %v2374_v41 }
 0x2a0   : > { %v2916_v43 = vpop.f32.mrb[56].mxu0  ;;  %626 = vmatprep.mubr.bf16.mxu1 %v3686_v0 }
 0x2a1   : > { %v2918_v47 = vpop.f32.mrb[57].mxu0 }
 0x2a2   : > { %v2920_v49 = vpop.f32.mrb[58].mxu0 }
 0x2a3   : > { %v2924_v55 = vpop.f32.mrb[59].mxu0 }
 0x2a7   : > { %2220 = vmatmul.mubr.msk.bf16.gmra.mrb[4].mxu1 %vm445_vm0, %v2375_v10 }
 0x2a8   : > { %v2928_v5 = vpop.f32.mrb[60].mxu0  ;;  %636 = vmatprep.mubr.bf16.mxu1 %v3686_v0 }
 0x2a9   : > { %v2930_v16 = vpop.f32.mrb[61].mxu0 }
 0x2aa   : > { %v2932_v22 = vpop.f32.mrb[62].mxu0 }
 0x2ab   : > { %v2936_v35 = vpop.f32.mrb[63].mxu0 }
 0x2af   : > { %2221 = vmatmul.mubr.msk.bf16.gmra.mrb[8].mxu1 %vm445_vm0, %v2376_v54 }
 0x2b0   : > { %v2940_v53 = vpop.f32.mrb[64].mxu0  ;;  %646 = vmatprep.mubr.bf16.mxu1 %v3686_v0 }
 0x2b1   : > { %v2942_v37 = vpop.f32.mrb[65].mxu0 }
 0x2b2   : > { %v2944_v31 = vpop.f32.mrb[66].mxu0 }
 0x2b3   : > { %v2948_v19 = vpop.f32.mrb[67].mxu0 }
 0x2c9   : > { %v940_v62 = vpop.xlane.xlu0 %939 }
 0x2ca   : > { %v1034_v7 = vsub.f32 %v2760_v59, %v940_v62  ;;  %v1035_v13 = vsub.f32 %v2762_v60, %v940_v62 }
 0x2cb   : > { %v943_v1 = vpop.xlane.xlu1 %942 }
 0x2cc   : > { %v1098_v58 = vmul.f32 1.442695, %v1034_v7  ;;  %v1100_v57 = vmul.f32 1.442695, %v1035_v13  ;;  %v1036_v41 = vsub.f32 %v2764_v61, %v943_v1  ;;  %v1037_v56 = vsub.f32 %v2768_v63, %v943_v1 }
 0x2ce   : > { %2402 = vpow2.f32 %v1098_v58  ;;  %v1102_v10 = vmul.f32 1.442695, %v1036_v41  ;;  %v1104_v52 = vmul.f32 1.442695, %v1037_v56  ;;  %v2377_v58 = vld [vmem:[%s3637_s3 + $0x18] sm:$0xff]  }
 0x2cf   : > { %2404 = vpow2.f32 %v1100_v57  ;;  %2222 = vmatmul.mubr.msk.bf16.gmra.mrb[12].mxu1 %vm445_vm0, %v2377_v58 }
 0x2d0   : > { %2406 = vpow2.f32 %v1102_v10 }
 0x2d1   : > { %2408 = vpow2.f32 %v1104_v52  ;;  %v946_v59 = vpop.xlane.xlu0 %945 }
 0x2d2   : > { %v1038_v60 = vsub.f32 %v2772_v2, %v946_v59  ;;  %v1039_v61 = vsub.f32 %v2774_v3, %v946_v59 }
 0x2d4   : > { %v1106_v63 = vmul.f32 1.442695, %v1038_v60  ;;  %v1108_v1 = vmul.f32 1.442695, %v1039_v61 }
 0x2d5   : > { %v949_v7 = vpop.xlane.xlu0 %948 }
 0x2d6   : > { %2410 = vpow2.f32 %v1106_v63  ;;  %v1040_v56 = vsub.f32 %v2776_v4, %v949_v7  ;;  %v1041_v54 = vsub.f32 %v2780_v6, %v949_v7  ;;  %v3687_v7 = vmax.f32 %v2904_v25, %v2906_v29 }
 0x2d7   : > { %2412 = vpow2.f32 %v1108_v1 }
 0x2d8   : > { %v2978_v52 = vpop.eup %2402  ;;  %v1110_v0 = vmul.f32 1.442695, %v1040_v56  ;;  %v1112_v57 = vmul.f32 1.442695, %v1041_v54 }
 0x2d9   : > { %v2981_v2 = vpop.eup %2404  ;;  %v952_v3 = vpop.xlane.xlu0 %951 }
 0x2da   : > { %v2983_v13 = vpop.eup %2406  ;;  %2414 = vpow2.f32 %v1110_v0  ;;  %v1042_v62 = vsub.f32 %v2784_v8, %v952_v3  ;;  %v1043_v41 = vsub.f32 %v2786_v9, %v952_v3  ;;  %v1226_v4 = vadd.f32 %v2981_v2, %v2978_v52 }
 0x2db   : > { %v2989_v6 = vpop.eup %2408  ;;  %2416 = vpow2.f32 %v1112_v57 }
 0x2dc   : > { %v1114_v10 = vmul.f32 1.442695, %v1042_v62  ;;  %v1116_v59 = vmul.f32 1.442695, %v1043_v41  ;;  %1227 = vadd.xlane.f32.xlu0 %v1226_v4  ;;  %v1229_v60 = vadd.f32 %v2989_v6, %v2983_v13 }
 0x2dd   : > { %v955_v61 = vpop.xlane.xlu0 %954 }
 0x2de   : > { %2418 = vpow2.f32 %v1114_v10  ;;  %v1044_v63 = vsub.f32 %v2790_v11, %v955_v61  ;;  %v1045_v8 = vsub.f32 %v2792_v12, %v955_v61  ;;  %1230 = vadd.xlane.f32.xlu1 %v1229_v60  ;;  %v3688_v12 = vmax.f32 %v2920_v49, %v2924_v55 }
 0x2df   : > { %2420 = vpow2.f32 %v1116_v59 }
 0x2e0   : > { %v2995_v9 = vpop.eup %2410  ;;  %v1118_v1 = vmul.f32 1.442695, %v1044_v63  ;;  %v1120_v58 = vmul.f32 1.442695, %v1045_v8  ;;  %1011 = vmax.xlane.f32.xlu0 %v3687_v7  ;;  %v3689_v8 = vmax.f32 %v2916_v43, %v2918_v47 }
 0x2e1   : > { %v3000_v56 = vpop.eup %2412  ;;  %v958_v54 = vpop.xlane.xlu0 %957 }
 0x2e2   : > { %2422 = vpow2.f32 %v1118_v1  ;;  %v1046_v0 = vsub.f32 %v2796_v14, %v958_v54  ;;  %v1047_v11 = vsub.f32 %v2798_v15, %v958_v54  ;;  %1020 = vmax.xlane.f32.xlu1 %v3688_v12  ;;  %v1232_v57 = vadd.f32 %v3000_v56, %v2995_v9 }
 0x2e3   : > { %2424 = vpow2.f32 %v1120_v58  ;;  %v3690_v12 = vmax.f32 %v2932_v22, %v2936_v35 }
 0x2e4   : > { %v3009_v3 = vpop.eup %2414  ;;  %v1122_v62 = vmul.f32 1.442695, %v1046_v0  ;;  %v1124_v41 = vmul.f32 1.442695, %v1047_v11  ;;  %1233 = vadd.xlane.f32.xlu0 %v1232_v57 }
 0x2e5   : > { %v3011_v4 = vpop.eup %2416  ;;  %v961_v10 = vpop.xlane.xlu0 %960 }
 0x2e6   : > { %2426 = vpow2.f32 %v1122_v62  ;;  %v1048_v14 = vsub.f32 %v2802_v17, %v961_v10  ;;  %v1049_v15 = vsub.f32 %v2804_v18, %v961_v10  ;;  %v1235_v59 = vadd.f32 %v3011_v4, %v3009_v3 }
 0x2e7   : > { %2428 = vpow2.f32 %v1124_v41 }
 0x2e8   : > { %v3017_v60 = vpop.eup %2418  ;;  %v1126_v61 = vmul.f32 1.442695, %v1048_v14  ;;  %v1128_v63 = vmul.f32 1.442695, %v1049_v15  ;;  %1017 = vmax.xlane.f32.xlu0 %v3689_v8  ;;  %1236 = vadd.xlane.f32.xlu1 %v1235_v59  ;;  %v3691_v59 = vmax.f32 %v2928_v5, %v2930_v16 }
 0x2e9   : > { %v3022_v1 = vpop.eup %2420  ;;  %v964_v58 = vpop.xlane.xlu0 %963 }
 0x2ea   : > { %2430 = vpow2.f32 %v1126_v61  ;;  %v1050_v17 = vsub.f32 %v2808_v20, %v964_v58  ;;  %v1051_v18 = vsub.f32 %v2810_v21, %v964_v58  ;;  %v1238_v7 = vadd.f32 %v3022_v1, %v3017_v60 }
 0x2eb   : > { %2432 = vpow2.f32 %v1128_v63 }
 0x2ec   : > { %v3028_v54 = vpop.eup %2422  ;;  %v1130_v0 = vmul.f32 1.442695, %v1050_v17  ;;  %v1132_v11 = vmul.f32 1.442695, %v1051_v18  ;;  %1239 = vadd.xlane.f32.xlu0 %v1238_v7  ;;  %1026 = vmax.xlane.f32.xlu1 %v3690_v12 }
 0x2ed   : > { %v3033_v57 = vpop.eup %2424  ;;  %v967_v62 = vpop.xlane.xlu0 %966 }
 0x2ee   : > { %2434 = vpow2.f32 %v1130_v0  ;;  %v1052_v20 = vsub.f32 %v2814_v23, %v967_v62  ;;  %v1053_v21 = vsub.f32 %v2816_v24, %v967_v62  ;;  %v1241_v41 = vadd.f32 %v3033_v57, %v3028_v54 }
 0x2ef   : > { %2436 = vpow2.f32 %v1132_v11  ;;  %v3692_v0 = vmax.f32 %v2944_v31, %v2948_v19 }
 0x2f0   : > { %v3039_v10 = vpop.eup %2426  ;;  %v1134_v14 = vmul.f32 1.442695, %v1052_v20  ;;  %v1136_v15 = vmul.f32 1.442695, %v1053_v21  ;;  %1023 = vmax.xlane.f32.xlu0 %v3691_v59  ;;  %1242 = vadd.xlane.f32.xlu1 %v1241_v41  ;;  %v3693_v41 = vmax.f32 %v2940_v53, %v2942_v37 }
 0x2f1   : > { %v3044_v61 = vpop.eup %2428  ;;  %v970_v63 = vpop.xlane.xlu0 %969 }
 0x2f2   : > { %2438 = vpow2.f32 %v1134_v14  ;;  %v1054_v23 = vsub.f32 %v2820_v26, %v970_v63  ;;  %v1055_v24 = vsub.f32 %v2822_v27, %v970_v63  ;;  %v1244_v8 = vadd.f32 %v3044_v61, %v3039_v10 }
 0x2f3   : > { %2440 = vpow2.f32 %v1136_v15  ;;  %v973_v58 = vpop.xlane.xlu1 %972 }
 0x2f4   : > { %v3050_v17 = vpop.eup %2430  ;;  %v1138_v18 = vmul.f32 1.442695, %v1054_v23  ;;  %v1140_v7 = vmul.f32 1.442695, %v1055_v24  ;;  %1245 = vadd.xlane.f32.xlu0 %v1244_v8  ;;  %1032 = vmax.xlane.f32.xlu1 %v3692_v0  ;;  %v1056_v11 = vsub.f32 %v2824_v28, %v973_v58  ;;  %v1057_v26 = vsub.f32 %v2828_v30, %v973_v58 }
 0x2f5   : > { %v3057_v12 = vpop.eup %2432 }
 0x2f6   : > { %2442 = vpow2.f32 %v1138_v18  ;;  %v1142_v27 = vmul.f32 1.442695, %v1056_v11  ;;  %v1144_v62 = vmul.f32 1.442695, %v1057_v26  ;;  %v1247_v20 = vadd.f32 %v3057_v12, %v3050_v17 }
 0x2f7   : > { %2444 = vpow2.f32 %v1140_v7 }
 0x2f8   : > { %v3061_v21 = vpop.eup %2434  ;;  %2446 = vpow2.f32 %v1142_v27  ;;  %1029 = vmax.xlane.f32.xlu0 %v3693_v41  ;;  %1248 = vadd.xlane.f32.xlu1 %v1247_v20 }
 0x2f9   : > { %v3066_v28 = vpop.eup %2436  ;;  %2448 = vpow2.f32 %v1144_v62  ;;  %v976_v30 = vpop.xlane.xlu0 %975 }
 0x2fa   : > { %v1058_v14 = vsub.f32 %v2832_v32, %v976_v30  ;;  %v1059_v15 = vsub.f32 %v2834_v33, %v976_v30  ;;  %v1250_v59 = vadd.f32 %v3066_v28, %v3061_v21 }
 0x2fb   : > { %v979_v63 = vpop.xlane.xlu1 %978 }
 0x2fc   : > { %v3072_v23 = vpop.eup %2438  ;;  %v1146_v24 = vmul.f32 1.442695, %v1058_v14  ;;  %v1148_v8 = vmul.f32 1.442695, %v1059_v15  ;;  %1251 = vadd.xlane.f32.xlu0 %v1250_v59  ;;  %v1060_v58 = vsub.f32 %v2836_v34, %v979_v63  ;;  %v1061_v18 = vsub.f32 %v2840_v36, %v979_v63 }
 0x2fd   : > { %v3076_v7 = vpop.eup %2440 }
 0x2fe   : > { %2450 = vpow2.f32 %v1146_v24  ;;  %v1150_v0 = vmul.f32 1.442695, %v1060_v58  ;;  %v1152_v32 = vmul.f32 1.442695, %v1061_v18  ;;  %v1253_v33 = vadd.f32 %v3076_v7, %v3072_v23 }
 0x2ff   : > { %2452 = vpow2.f32 %v1148_v8 }
 0x300   : > { %v3080_v11 = vpop.eup %2442  ;;  %2454 = vpow2.f32 %v1150_v0  ;;  %1254 = vadd.xlane.f32.xlu1 %v1253_v33 }
 0x301   : > { %v3082_v26 = vpop.eup %2444  ;;  %2456 = vpow2.f32 %v1152_v32  ;;  %v982_v27 = vpop.xlane.xlu0 %981 }
 0x302   : > { %v3084_v34 = vpop.eup %2446  ;;  %v1062_v36 = vsub.f32 %v2844_v38, %v982_v27  ;;  %v1063_v62 = vsub.f32 %v2846_v39, %v982_v27  ;;  %v1256_v20 = vadd.f32 %v3082_v26, %v3080_v11 }
 0x303   : > { %v3090_v41 = vpop.eup %2448  ;;  %v985_v30 = vpop.xlane.xlu1 %984 }
 0x304   : > { %v1154_v14 = vmul.f32 1.442695, %v1062_v36  ;;  %v1156_v15 = vmul.f32 1.442695, %v1063_v62  ;;  %1257 = vadd.xlane.f32.xlu0 %v1256_v20  ;;  %v1064_v59 = vsub.f32 %v2848_v40, %v985_v30  ;;  %v1065_v63 = vsub.f32 %v2852_v42, %v985_v30 }
 0x305   : > { %v1259_v24 = vadd.f32 %v3090_v41, %v3084_v34 }
 0x306   : > { %2458 = vpow2.f32 %v1154_v14  ;;  %v1158_v38 = vmul.f32 1.442695, %v1064_v59  ;;  %v1160_v8 = vmul.f32 1.442695, %v1065_v63 }
 0x307   : > { %2460 = vpow2.f32 %v1156_v15  ;;  %1260 = vadd.xlane.f32.xlu1 %v1259_v24 }
 0x308   : > { %v3096_v39 = vpop.eup %2450  ;;  %2462 = vpow2.f32 %v1158_v38 }
 0x309   : > { %v3098_v58 = vpop.eup %2452  ;;  %2464 = vpow2.f32 %v1160_v8  ;;  %v988_v18 = vpop.xlane.xlu0 %987 }
 0x30a   : > { %v3100_v0 = vpop.eup %2454  ;;  %v1066_v40 = vsub.f32 %v2856_v44, %v988_v18  ;;  %v1067_v42 = vsub.f32 %v2858_v45, %v988_v18  ;;  %v1262_v32 = vadd.f32 %v3098_v58, %v3096_v39 }
 0x30b   : > { %v3106_v33 = vpop.eup %2456  ;;  %v991_v27 = vpop.xlane.xlu1 %990 }
 0x30c   : > { %v1162_v36 = vmul.f32 1.442695, %v1066_v40  ;;  %v1164_v62 = vmul.f32 1.442695, %v1067_v42  ;;  %1263 = vadd.xlane.f32.xlu0 %v1262_v32  ;;  %v1068_v20 = vsub.f32 %v2860_v46, %v991_v27  ;;  %v1069_v30 = vsub.f32 %v2864_v48, %v991_v27  ;;  %v3695_v32 = vld [vmem:[#allocation3_spill] sm:$0xff] }
 0x30d   : > { %v1265_v14 = vadd.f32 %v3106_v33, %v3100_v0 }
 0x30e   : > { %2466 = vpow2.f32 %v1162_v36  ;;  %v1166_v44 = vmul.f32 1.442695, %v1068_v20  ;;  %v1168_v15 = vmul.f32 1.442695, %v1069_v30  ;;  %v3696_v36 = vld [vmem:[#allocation4_spill] sm:$0xff] }
 0x30f   : > { %2468 = vpow2.f32 %v1164_v62  ;;  %1266 = vadd.xlane.f32.xlu1 %v1265_v14 }
 0x310   : > { %v3112_v45 = vpop.eup %2458  ;;  %2470 = vpow2.f32 %v1166_v44 }
 0x311   : > { %3694 = vst [vmem:[#allocation15_spill] sm:$0xff] %v3112_v45  ;;  %v3114_v59 = vpop.eup %2460  ;;  %2472 = vpow2.f32 %v1168_v15  ;;  %v994_v63 = vpop.xlane.xlu0 %993 }
 0x312   : > { %v3116_v24 = vpop.eup %2462  ;;  %v1070_v46 = vsub.f32 %v2868_v50, %v994_v63  ;;  %v1071_v48 = vsub.f32 %v2870_v51, %v994_v63  ;;  %v1268_v38 = vadd.f32 %v3114_v59, %v3112_v45  ;;  %v3700_v63 = vld [vmem:[#allocation5_spill] sm:$0xff] }
 0x313   : > { %v3122_v8 = vpop.eup %2464  ;;  %v997_v18 = vpop.xlane.xlu1 %996 }
 0x314   : > { %v1170_v40 = vmul.f32 1.442695, %v1070_v46  ;;  %v1172_v42 = vmul.f32 1.442695, %v1071_v48  ;;  %1269 = vadd.xlane.f32.xlu0 %v1268_v38  ;;  %v1072_v27 = vsub.f32 %v3695_v32, %v997_v18  ;;  %v1073_v62 = vsub.f32 %v3696_v36, %v997_v18  ;;  %v3701_v48 = vld [vmem:[#allocation6_spill] sm:$0xff]  ;;  %v3703_v36 = vld [vmem:[#allocation7_spill] sm:$0xff] }
 0x315   : > { %v1271_v20 = vadd.f32 %v3122_v8, %v3116_v24 }
 0x316   : > { %2474 = vpow2.f32 %v1170_v40  ;;  %v1174_v50 = vmul.f32 1.442695, %v1072_v27  ;;  %v1176_v30 = vmul.f32 1.442695, %v1073_v62 }
 0x317   : > { %2476 = vpow2.f32 %v1172_v42  ;;  %1272 = vadd.xlane.f32.xlu1 %v1271_v20  ;;  %v3704_v20 = vld [vmem:[#allocation8_spill] sm:$0xff] }
 0x318   : > { %v3128_v51 = vpop.eup %2466  ;;  %2478 = vpow2.f32 %v1174_v50 }
 0x319   : > { %3697 = vst [vmem:[#allocation3_spill] sm:$0xff] %v3128_v51  ;;  %v3130_v14 = vpop.eup %2468  ;;  %2480 = vpow2.f32 %v1176_v30  ;;  %v1000_v44 = vpop.xlane.xlu0 %999 }
 0x31a   : > { %3698 = vst [vmem:[#allocation4_spill] sm:$0xff] %v3130_v14  ;;  %v3132_v15 = vpop.eup %2470  ;;  %v1074_v46 = vsub.f32 %v3700_v63, %v1000_v44  ;;  %v1075_v38 = vsub.f32 %v3701_v48, %v1000_v44  ;;  %v1274_v18 = vadd.f32 %v3130_v14, %v3128_v51 }
 0x31b   : > { %3699 = vst [vmem:[#allocation16_spill] sm:$0xff] %v3132_v15  ;;  %v3138_v40 = vpop.eup %2472  ;;  %v1003_v42 = vpop.xlane.xlu1 %1002 }
 0x31c   : > { %3702 = vst [vmem:[#allocation5_spill] sm:$0xff] %v3138_v40  ;;  %v1178_v32 = vmul.f32 1.442695, %v1074_v46  ;;  %v1180_v27 = vmul.f32 1.442695, %v1075_v38  ;;  %1275 = vadd.xlane.f32.xlu0 %v1274_v18  ;;  %v1076_v62 = vsub.f32 %v3703_v36, %v1003_v42  ;;  %v1077_v50 = vsub.f32 %v3704_v20, %v1003_v42  ;;  %v3705_v18 = vld [vmem:[#allocation9_spill] sm:$0xff] }
 0x31d   : > { %v1277_v30 = vadd.f32 %v3138_v40, %v3132_v15  ;;  %v3706_v42 = vld [vmem:[#allocation10_spill] sm:$0xff]  ;;  %v3708_v15 = vld [vmem:[#allocation12_spill] sm:$0xff] }
 0x31e   : > { %2482 = vpow2.f32 %v1178_v32  ;;  %v1182_v63 = vmul.f32 1.442695, %v1076_v62  ;;  %v1184_v45 = vmul.f32 1.442695, %v1077_v50 }
 0x31f   : > { %2484 = vpow2.f32 %v1180_v27  ;;  %1278 = vadd.xlane.f32.xlu1 %v1277_v30 }
 0x320   : > { %v3144_v44 = vpop.eup %2474  ;;  %2486 = vpow2.f32 %v1182_v63  ;;  %v3707_v63 = vld [vmem:[#allocation11_spill] sm:$0xff] }
 0x321   : > { %v3146_v48 = vpop.eup %2476  ;;  %2488 = vpow2.f32 %v1184_v45  ;;  %v1006_v46 = vpop.xlane.xlu0 %1005 }
 0x322   : > { %v3148_v38 = vpop.eup %2478  ;;  %v1078_v36 = vsub.f32 %v3705_v18, %v1006_v46  ;;  %v1079_v20 = vsub.f32 %v3706_v42, %v1006_v46  ;;  %v1280_v32 = vadd.f32 %v3146_v48, %v3144_v44 }
 0x323   : > { %v3154_v62 = vpop.eup %2480  ;;  %v1009_v27 = vpop.xlane.xlu1 %1008 }
 0x324   : > { %v1186_v50 = vmul.f32 1.442695, %v1078_v36  ;;  %v1188_v30 = vmul.f32 1.442695, %v1079_v20  ;;  %1281 = vadd.xlane.f32.xlu0 %v1280_v32  ;;  %v1080_v51 = vsub.f32 %v3707_v63, %v1009_v27  ;;  %v1081_v45 = vsub.f32 %v3708_v15, %v1009_v27  ;;  %v3712_v27 = vld [vmem:[#allocation13_spill] sm:$0xff] }
 0x325   : > { %v1283_v40 = vadd.f32 %v3154_v62, %v3148_v38 }
 0x326   : > { %2490 = vpow2.f32 %v1186_v50  ;;  %v1190_v18 = vmul.f32 1.442695, %v1080_v51  ;;  %v1192_v14 = vmul.f32 1.442695, %v1081_v45  ;;  %v3713_v50 = vld [vmem:[#allocation14_spill] sm:$0xff] }
 0x327   : > { %2492 = vpow2.f32 %v1188_v30  ;;  %1284 = vadd.xlane.f32.xlu1 %v1283_v40 }
 0x328   : > { %v3160_v46 = vpop.eup %2482  ;;  %2494 = vpow2.f32 %v1190_v18 }
 0x329   : > { %3709 = vst [vmem:[#allocation6_spill] sm:$0xff] %v3160_v46  ;;  %v3162_v42 = vpop.eup %2484  ;;  %2496 = vpow2.f32 %v1192_v14 }
 0x32a   : > { %v3164_v36 = vpop.eup %2486  ;;  %v1286_v20 = vadd.f32 %v3162_v42, %v3160_v46 }
 0x32b   : > { %3710 = vst [vmem:[#allocation7_spill] sm:$0xff] %v3164_v36  ;;  %v3168_v15 = vpop.eup %2488  ;;  %v1015_v32 = vpop.xlane.xlu1 %1014 }
 0x32c   : > { %3711 = vst [vmem:[#allocation8_spill] sm:$0xff] %v3168_v15  ;;  %1287 = vadd.xlane.f32.xlu0 %v1286_v20  ;;  %v1084_v51 = vsub.f32 %v3712_v27, %v1015_v32  ;;  %v1085_v30 = vsub.f32 %v3713_v50, %v1015_v32  ;;  %v1289_v40 = vadd.f32 %v3168_v15, %v3164_v36 }
 0x32e   : > { %v1198_v63 = vmul.f32 1.442695, %v1084_v51  ;;  %v1200_v45 = vmul.f32 1.442695, %v1085_v30  ;;  %1290 = vadd.xlane.f32.xlu1 %v1289_v40 }
 0x330   : > { %v3174_v14 = vpop.eup %2490  ;;  %2498 = vpow2.f32 %v1198_v63 }
 0x331   : > { %3714 = vst [vmem:[#allocation9_spill] sm:$0xff] %v3174_v14  ;;  %v3176_v18 = vpop.eup %2492  ;;  %2500 = vpow2.f32 %v1200_v45 }
 0x332   : > { %3715 = vst [vmem:[#allocation10_spill] sm:$0xff] %v3176_v18  ;;  %v3178_v46 = vpop.eup %2494  ;;  %v1292_v20 = vadd.f32 %v3176_v18, %v3174_v14 }
 0x333   : > { %3716 = vst [vmem:[#allocation11_spill] sm:$0xff] %v3178_v46  ;;  %v3182_v27 = vpop.eup %2496 }
 0x334   : > { %3717 = vst [vmem:[#allocation12_spill] sm:$0xff] %v3182_v27  ;;  %1293 = vadd.xlane.f32.xlu0 %v1292_v20  ;;  %v1295_v32 = vadd.f32 %v3182_v27, %v3178_v46 }
 0x336   : > { %1296 = vadd.xlane.f32.xlu1 %v1295_v32 }
 0x33a   : > { %v3186_v51 = vpop.eup %2498 }
 0x33b   : > { %3718 = vst [vmem:[#allocation13_spill] sm:$0xff] %v3186_v51  ;;  %v3188_v50 = vpop.eup %2500 }
 0x33c   : > { %3719 = vst [vmem:[#allocation14_spill] sm:$0xff] %v3188_v50  ;;  %v1301_v30 = vadd.f32 %v3188_v50, %v3186_v51 }
 0x33e   : > { %1302 = vadd.xlane.f32.xlu1 %v1301_v30 }
 0x369   : > { %v1228_v40 = vpop.xlane.xlu0 %1227 }
 0x36a   : > { %2502 = vrcp.f32 %v1228_v40 }
 0x36b   : > { %v1231_v63 = vpop.xlane.xlu1 %1230 }
 0x36c   : > { %2504 = vrcp.f32 %v1231_v63 }
 0x36d   : > { %v1012_v45 = vpop.xlane.xlu0 %1011 }
 0x36e   : > { %v1082_v14 = vsub.f32 %v2904_v25, %v1012_v45  ;;  %v1083_v20 = vsub.f32 %v2906_v29, %v1012_v45 }
 0x36f   : > { %v1021_v18 = vpop.xlane.xlu1 %1020 }
 0x370   : > { %v1194_v46 = vmul.f32 1.442695, %v1082_v14  ;;  %v1196_v32 = vmul.f32 1.442695, %v1083_v20  ;;  %v1088_v27 = vsub.f32 %v2920_v49, %v1021_v18  ;;  %v1089_v36 = vsub.f32 %v2924_v55, %v1021_v18 }
 0x371   : > { %v1234_v15 = vpop.xlane.xlu0 %1233 }
 0x372   : > { %2506 = vpow2.f32 %v1194_v46  ;;  %v1206_v51 = vmul.f32 1.442695, %v1088_v27  ;;  %v1208_v30 = vmul.f32 1.442695, %v1089_v36 }
 0x373   : > { %2508 = vpow2.f32 %v1196_v32 }
 0x374   : > { %v2503_v40 = vpop.eup %2502  ;;  %2510 = vpow2.f32 %v1206_v51 }
 0x375   : > { %2512 = vpow2.f32 %v1208_v30  ;;  %v1018_v63 = vpop.xlane.xlu0 %1017  ;;  %v1237_v50 = vpop.xlane.xlu1 %1236  ;;  %v1355_v49 = vmul.f32 %v2503_v40, %v2981_v2  ;;  %v1354_v46 = vmul.f32 %v2503_v40, %v2978_v52 }
 0x376   : > { %v2505_v25 = vpop.eup %2504  ;;  %2514 = vrcp.f32 %v1234_v15  ;;  %v1086_v29 = vsub.f32 %v2916_v43, %v1018_v63  ;;  %v1087_v14 = vsub.f32 %v2918_v47, %v1018_v63 }
 0x377   : > { %2516 = vrcp.f32 %v1237_v50  ;;  %v1357_v55 = vmul.f32 %v2505_v25, %v2989_v6  ;;  %v1356_v36 = vmul.f32 %v2505_v25, %v2983_v13 }
 0x378   : > { %v1202_v18 = vmul.f32 1.442695, %v1086_v29  ;;  %v1204_v27 = vmul.f32 1.442695, %v1087_v14 }
 0x379   : > { %v1240_v51 = vpop.xlane.xlu0 %1239  ;;  %v1027_v45 = vpop.xlane.xlu1 %1026  ;;  %v1427_v20 = vpack.c.bf16 %v1357_v55, %v1355_v49  ;;  %v1426_v32 = vpack.c.bf16 %v1356_v36, %v1354_v46 }
 0x37a   : > { %2518 = vpow2.f32 %v1202_v18  ;;  %v1092_v43 = vsub.f32 %v2932_v22, %v1027_v45  ;;  %v1093_v47 = vsub.f32 %v2936_v35, %v1027_v45 }
 0x37b   : > { %2520 = vpow2.f32 %v1204_v27  ;;  %1458 = vmatprep.subr.bf16.mxu1 %v1427_v20 }
 0x37c   : > { %v3204_v2 = vpop.eup %2506  ;;  %v1214_v6 = vmul.f32 1.442695, %v1092_v43  ;;  %v1216_v15 = vmul.f32 1.442695, %v1093_v47  ;;  %1459 = vmatpush1.bf16.xpose.msra.mxu1 %v1426_v32  ;;  %2522 = vrcp.f32 %v1240_v51 }
 0x37d   : > { %v3206_v52 = vpop.eup %2508  ;;  %v1024_v13 = vpop.xlane.xlu0 %1023 }
 0x37e   : > { %v1243_v50 = vpop.xlane.xlu1 %1242  ;;  %v3208_v30 = vpop.eup %2510  ;;  %2524 = vpow2.f32 %v1214_v6  ;;  %v1090_v40 = vsub.f32 %v2928_v5, %v1024_v13  ;;  %v1091_v22 = vsub.f32 %v2930_v16, %v1024_v13  ;;  %v1298_v35 = vadd.f32 %v3206_v52, %v3204_v2 }
 0x37f   : > { %v3214_v63 = vpop.eup %2512  ;;  %2526 = vpow2.f32 %v1216_v15 }
 0x380   : > { %v2515_v25 = vpop.eup %2514  ;;  %v1210_v29 = vmul.f32 1.442695, %v1090_v40  ;;  %v1212_v14 = vmul.f32 1.442695, %v1091_v22  ;;  %2528 = vrcp.f32 %v1243_v50  ;;  %1299 = vadd.xlane.f32.xlu0 %v1298_v35  ;;  %v1307_v49 = vadd.f32 %v3214_v63, %v3208_v30 }
 0x381   : > { %v2517_v55 = vpop.eup %2516  ;;  %v1246_v46 = vpop.xlane.xlu0 %1245  ;;  %v1359_v5 = vmul.f32 %v2515_v25, %v3000_v56  ;;  %v1358_v18 = vmul.f32 %v2515_v25, %v2995_v9 }
 0x382   : > { %v3218_v36 = vpop.xlane.xlu1 %1032  ;;  %2530 = vpow2.f32 %v1210_v29  ;;  %1308 = vadd.xlane.f32.xlu1 %v1307_v49  ;;  %v1361_v16 = vmul.f32 %v2517_v55, %v3011_v4  ;;  %v1360_v27 = vmul.f32 %v2517_v55, %v3009_v3 }
 0x383   : > { %2532 = vpow2.f32 %v1212_v14 }
 0x384   : > { %v3224_v51 = vpop.eup %2518  ;;  %v1429_v45 = vpack.c.bf16 %v1361_v16, %v1359_v5  ;;  %2534 = vrcp.f32 %v1246_v46  ;;  %v1428_v47 = vpack.c.bf16 %v1360_v27, %v1358_v18 }
 0x385   : > { %v3226_v20 = vpop.eup %2520  ;;  %v1030_v32 = vpop.xlane.xlu0 %1029 }
 0x386   : > { %v1249_v43 = vpop.xlane.xlu1 %1248  ;;  %v1094_v6 = vsub.f32 %v2940_v53, %v1030_v32  ;;  %v1095_v56 = vsub.f32 %v2942_v37, %v1030_v32  ;;  %1460 = vmatprep.subr.bf16.mxu1 %v1429_v45  ;;  %v1304_v4 = vadd.f32 %v3226_v20, %v3224_v51  ;;  %v2523_v9 = vpop.eup %2522 }
 0x387   : > { %1461 = vmatpush1.bf16.xpose.msra.mxu1 %v1428_v47  ;;  %2536 = vrcp.f32 %v1249_v43  ;;  %v1363_v53 = vmul.f32 %v2523_v9, %v3022_v1  ;;  %v1362_v25 = vmul.f32 %v2523_v9, %v3017_v60 }
 0x388   : > { %v3232_v3 = vpop.eup %2524  ;;  %v1218_v15 = vmul.f32 1.442695, %v1094_v6  ;;  %v1220_v13 = vmul.f32 1.442695, %v1095_v56  ;;  %1305 = vadd.xlane.f32.xlu0 %v1304_v4 }
 0x389   : > { %v3234_v50 = vpop.eup %2526  ;;  %v1252_v40 = vpop.xlane.xlu0 %1251 }
 0x38a   : > { %v2529_v22 = vpop.eup %2528  ;;  %2538 = vpow2.f32 %v1218_v15  ;;  %v1313_v37 = vadd.f32 %v3234_v50, %v3232_v3 }
 0x38b   : > { %2540 = vpow2.f32 %v1220_v13  ;;  %v1365_v35 = vmul.f32 %v2529_v22, %v3033_v57  ;;  %v1364_v29 = vmul.f32 %v2529_v22, %v3028_v54  ;;  %v505_v13 = vld [vmem:[%s3638_s4 + $0x8] sm:$0xff]  ;;  %v3265_v22 = vpop.f32.mrb[0].mxu1 }
 0x38c   : > { %v3242_v14 = vpop.eup %2530  ;;  %2542 = vrcp.f32 %v1252_v40  ;;  %1314 = vadd.xlane.f32.xlu1 %v1313_v37 }
 0x38d   : > { %v3244_v49 = vpop.eup %2532  ;;  %v1431_v55 = vpack.c.bf16 %v1365_v35, %v1363_v53  ;;  %v1255_v46 = vpop.xlane.xlu1 %1254  ;;  %v1430_v5 = vpack.c.bf16 %v1364_v29, %v1362_v25 }
 0x38e   : > { %2544 = vrcp.f32 %v1255_v46  ;;  %v1310_v1 = vadd.f32 %v3244_v49, %v3242_v14  ;;  %v2535_v16 = vpop.eup %2534  ;;  %v3267_v53 = vpop.f32.mrb[1].mxu1 }
 0x38f   : > { %1462 = vmatprep.subr.bf16.mxu1 %v1431_v55  ;;  %v1367_v54 = vmul.f32 %v2535_v16, %v3044_v61  ;;  %v1366_v27 = vmul.f32 %v2535_v16, %v3039_v10  ;;  %v3269_v29 = vpop.f32.mrb[2].mxu1 }
 0x390   : > { %1463 = vmatpush1.bf16.xpose.msra.mxu1 %v1430_v5  ;;  %1311 = vadd.xlane.f32.xlu0 %v1310_v1 }
 0x391   : > { %v1258_v60 = vpop.xlane.xlu0 %1257  ;;  %v2537_v57 = vpop.eup %2536 }
 0x392   : > { %2546 = vrcp.f32 %v1258_v60  ;;  %v1369_v18 = vmul.f32 %v2537_v57, %v3057_v12  ;;  %v1368_v45 = vmul.f32 %v2537_v57, %v3050_v17 }
 0x394   : > { %v3252_v32 = vpop.eup %2538  ;;  %v1261_v43 = vpop.xlane.xlu1 %1260  ;;  %v1433_v6 = vpack.c.bf16 %v1369_v18, %v1367_v54  ;;  %v1432_v56 = vpack.c.bf16 %v1368_v45, %v1366_v27 }
 0x395   : > { %v3254_v47 = vpop.eup %2540  ;;  %2548 = vrcp.f32 %v1261_v43 }
 0x396   : > { %v2543_v4 = vpop.eup %2542  ;;  %v1316_v9 = vadd.f32 %v3254_v47, %v3252_v32  ;;  %1464 = vmatprep.subr.bf16.mxu1 %v1433_v6 }
 0x397   : > { %v1371_v10 = vmul.f32 %v2543_v4, %v3066_v28  ;;  %v1370_v40 = vmul.f32 %v2543_v4, %v3061_v21 }
 0x398   : > { %v2545_v61 = vpop.eup %2544  ;;  %1465 = vmatpush1.bf16.xpose.msra.mxu1 %v1432_v56  ;;  %1317 = vadd.xlane.f32.xlu0 %v1316_v9 }
 0x399   : > { %v1264_v12 = vpop.xlane.xlu0 %1263  ;;  %v1373_v17 = vmul.f32 %v2545_v61, %v3076_v7  ;;  %v1372_v15 = vmul.f32 %v2545_v61, %v3072_v23  ;;  %v3271_v23 = vpop.f32.mrb[3].mxu1 }
 0x39a   : > { %2550 = vrcp.f32 %v1264_v12  ;;  %v3293_v12 = vpop.f32.mrb[4].mxu1 }
 0x39b   : > { %v1435_v37 = vpack.c.bf16 %v1373_v17, %v1371_v10  ;;  %v1434_v25 = vpack.c.bf16 %v1372_v15, %v1370_v40  ;;  %v3295_v10 = vpop.f32.mrb[5].mxu1 }
 0x39c   : > { %v1267_v35 = vpop.xlane.xlu1 %1266  ;;  %v2547_v28 = vpop.eup %2546 }
 0x39d   : > { %2552 = vrcp.f32 %v1267_v35  ;;  %519 = vperm.xlu1 %2372, %v505_v13   ;;  %1466 = vmatprep.subr.bf16.mxu1 %v1435_v37  ;;  %v1375_v21 = vmul.f32 %v2547_v28, %v3082_v26  ;;  %v1374_v60 = vmul.f32 %v2547_v28, %v3080_v11  ;;  %v504_v11 = vld [vmem:[%s3638_s4] sm:$0xff]  ;;  %v3298_v13 = vpop.f32.mrb[6].mxu1 }
 0x39e   : > { %v3303_v40 = vpop.f32.mrb[7].mxu1  ;;  %v3720_v37 = vld [vmem:[#allocation15_spill] sm:$0xff] }
 0x39f   : > { %v2549_v7 = vpop.eup %2548 }
 0x3a0   : > { %1467 = vmatpush1.bf16.xpose.msra.mxu1 %v1434_v25  ;;  %v1377_v55 = vmul.f32 %v2549_v7, %v3090_v41  ;;  %v1376_v1 = vmul.f32 %v2549_v7, %v3084_v34  ;;  %v1096_v41 = vsub.f32 %v2944_v31, %v3218_v36  ;;  %v1097_v34 = vsub.f32 %v2948_v19, %v3218_v36  ;;  %v507_v19 = vld [vmem:[%s3638_s4 + $0x18] sm:$0xff]  ;;  %v3306_v25 = vpop.f32.mrb[8].mxu1 }
 0x3a1   : > { %v1270_v46 = vpop.xlane.xlu0 %1269  ;;  %v3308_v7 = vpop.f32.mrb[9].mxu1 }
 0x3a2   : > { %v1437_v5 = vpack.c.bf16 %v1377_v55, %v1375_v21  ;;  %2554 = vrcp.f32 %v1270_v46  ;;  %v1436_v54 = vpack.c.bf16 %v1376_v1, %v1374_v60  ;;  %v1222_v4 = vmul.f32 1.442695, %v1096_v41  ;;  %v3310_v21 = vpop.f32.mrb[10].mxu1  ;;  %v511_v46 = vld [vmem:[%s3638_s4 + $0x38] sm:$0xff]  ;;  %v3721_v1 = vld [vmem:[#allocation4_spill] sm:$0xff]  ;;  %v3722_v60 = vld [vmem:[#allocation5_spill] sm:$0xff] }
 0x3a3   : > { %v1224_v31 = vmul.f32 1.442695, %v1097_v34  ;;  %v3723_v41 = vld [vmem:[#allocation16_spill] sm:$0xff] }
 0x3a4   : > { %1468 = vmatprep.subr.bf16.mxu1 %v1437_v5  ;;  %v1273_v16 = vpop.xlane.xlu1 %1272  ;;  %v2551_v57 = vpop.eup %2550 }
 0x3a5   : > { %2556 = vrcp.f32 %v1273_v16  ;;  %v1379_v27 = vmul.f32 %v2551_v57, %v3098_v58  ;;  %v1378_v58 = vmul.f32 %v2551_v57, %v3096_v39  ;;  %v3315_v5 = vpop.f32.mrb[11].mxu1 }
 0x3a7   : > { %v2553_v18 = vpop.eup %2552 }
 0x3a8   : > { %1469 = vmatpush1.bf16.xpose.msra.mxu1 %v1436_v54  ;;  %v1381_v26 = vmul.f32 %v2553_v18, %v3106_v33  ;;  %v1380_v6 = vmul.f32 %v2553_v18, %v3100_v0  ;;  %v3319_v54 = vpop.f32.mrb[12].mxu1 }
 0x3a9   : > { %v1276_v45 = vpop.xlane.xlu0 %1275 }
 0x3aa   : > { %v1439_v43 = vpack.c.bf16 %v1381_v26, %v1379_v27  ;;  %2558 = vrcp.f32 %v1276_v45  ;;  %v1438_v9 = vpack.c.bf16 %v1380_v6, %v1378_v58  ;;  %v3321_v27 = vpop.f32.mrb[13].mxu1 }
 0x3ab   : > { %v3324_v34 = vpop.f32.mrb[14].mxu1 }
 0x3ac   : > { %1470 = vmatprep.subr.bf16.mxu1 %v1439_v43  ;;  %v1279_v56 = vpop.xlane.xlu1 %1278  ;;  %v2555_v33 = vpop.eup %2554 }
 0x3ad   : > { %2560 = vrcp.f32 %v1279_v56  ;;  %v1383_v0 = vmul.f32 %v2555_v33, %v3114_v59  ;;  %v509_v59 = vld [vmem:[%s3638_s4 + $0x28] sm:$0xff]  ;;  %v1382_v35 = vmul.f32 %v2555_v33, %v3720_v37  ;;  %v3331_v56 = vpop.f32.mrb[15].mxu1  ;;  %v3724_v33 = vld [vmem:[#allocation3_spill] sm:$0xff] }
 0x3ae   : > { %514 = vperm.xlu0 %2371, %v504_v11   ;;  %2562 = vpow2.f32 %v1222_v4  ;;  %v1803_v11 = vld [vmem:[%s3640_s6 + $0x8] sm:$0xff] }
 0x3af   : > { %v2557_v61 = vpop.eup %2556  ;;  %2564 = vpow2.f32 %v1224_v31  ;;  %v1807_v37 = vld [vmem:[%s3640_s6 + $0x28] sm:$0xff] }
 0x3b0   : > { %1471 = vmatpush1.bf16.xpose.msra.mxu1 %v1438_v9  ;;  %v1385_v36 = vmul.f32 %v2557_v61, %v3122_v8  ;;  %v1384_v15 = vmul.f32 %v2557_v61, %v3116_v24 }
 0x3b1   : > { %v1282_v39 = vpop.xlane.xlu0 %1281 }
 0x3b2   : > { %529 = vperm.xlu0 %2371, %v507_v19   ;;  %v1441_v17 = vpack.c.bf16 %v1385_v36, %v1383_v0  ;;  %2566 = vrcp.f32 %v1282_v39  ;;  %v1440_v24 = vpack.c.bf16 %v1384_v15, %v1382_v35  ;;  %v1805_v0 = vld [vmem:[%s3640_s6 + $0x18] sm:$0xff] }
 0x3b4   : > { %1472 = vmatprep.subr.bf16.mxu1 %v1441_v17  ;;  %v1285_v8 = vpop.xlane.xlu1 %1284  ;;  %v2559_v28 = vpop.eup %2558 }
 0x3b5   : > { %2568 = vrcp.f32 %v1285_v8  ;;  %v1387_v16 = vmul.f32 %v2559_v28, %v3721_v1  ;;  %v1386_v4 = vmul.f32 %v2559_v28, %v3724_v33 }
 0x3b6   : > { %539 = vperm.xlu0 %2371, %v509_v59  }
 0x3b7   : > { %v2561_v55 = vpop.eup %2560 }
 0x3b8   : > { %1473 = vmatpush1.bf16.xpose.msra.mxu1 %v1440_v24  ;;  %v1389_v57 = vmul.f32 %v2561_v55, %v3722_v60  ;;  %v1388_v45 = vmul.f32 %v2561_v55, %v3723_v41  ;;  %v3326_v43 = vpop.eup %2562  ;;  %v1809_v24 = vld [vmem:[%s3640_s6 + $0x38] sm:$0xff] }
 0x3b9   : > { %v1288_v18 = vpop.xlane.xlu0 %1287  ;;  %v3333_v58 = vpop.eup %2564 }
 0x3ba   : > { %549 = vperm.xlu0 %2371, %v511_v46   ;;  %2570 = vrcp.f32 %v1288_v18  ;;  %v1443_v26 = vpack.c.bf16 %v1389_v57, %v1387_v16  ;;  %v1442_v9 = vpack.c.bf16 %v1388_v45, %v1386_v4  ;;  %v1319_v19 = vadd.f32 %v3333_v58, %v3326_v43  ;;  %v3726_v16 = vld [vmem:[#allocation7_spill] sm:$0xff]  ;;  %v3727_v18 = vld [vmem:[#allocation6_spill] sm:$0xff]  ;;  %v3729_v4 = vld [vmem:[#allocation12_spill] sm:$0xff] }
 0x3bb   : > { %v1291_v6 = vpop.xlane.xlu1 %1290 }
 0x3bc   : > { %1474 = vmatprep.subr.bf16.mxu1 %v1443_v26  ;;  %2572 = vrcp.f32 %v1291_v6  ;;  %v2567_v31 = vpop.eup %2566  ;;  %v506_v6 = vld [vmem:[%s3638_s4 + $0x10] sm:$0xff] }
 0x3bd   : > { %v1391_v36 = vmul.f32 %v2567_v31, %v3146_v48  ;;  %v1390_v28 = vmul.f32 %v2567_v31, %v3144_v44  ;;  %v1811_v44 = vld [vmem:[%s3640_s6 + $0x48] sm:$0xff] }
 0x3be   : > { %1826 = vperm.xlu0 %2371, %v1803_v11   ;;  %v3728_v11 = vld [vmem:[#allocation10_spill] sm:$0xff] }
 0x3bf   : > { %v2569_v61 = vpop.eup %2568 }
 0x3c0   : > { %1475 = vmatpush1.bf16.xpose.msra.mxu1 %v1442_v9  ;;  %v1393_v39 = vmul.f32 %v2569_v61, %v3154_v62  ;;  %v1392_v59 = vmul.f32 %v2569_v61, %v3148_v38  ;;  %v3725_v38 = vld [vmem:[#allocation8_spill] sm:$0xff]  ;;  %v3730_v61 = vld [vmem:[#allocation11_spill] sm:$0xff] }
 0x3c1   : > { %1320 = vadd.xlane.f32.xlu1 %v1319_v19  ;;  %v1294_v17 = vpop.xlane.xlu0 %1293 }
 0x3c2   : > { %1836 = vperm.xlu0 %2371, %v1805_v0   ;;  %2574 = vrcp.f32 %v1294_v17  ;;  %v1445_v15 = vpack.c.bf16 %v1393_v39, %v1391_v36  ;;  %v1444_v62 = vpack.c.bf16 %v1392_v59, %v1390_v28  ;;  %v1815_v0 = vld [vmem:[%s3640_s6 + $0x68] sm:$0xff]  ;;  %v508_v36 = vld [vmem:[%s3638_s4 + $0x20] sm:$0xff]  ;;  %v3731_v39 = vld [vmem:[#allocation9_spill] sm:$0xff] }
 0x3c3   : > { %v1297_v8 = vpop.xlane.xlu1 %1296  ;;  %v1817_v59 = vld [vmem:[%s3640_s6 + $0x78] sm:$0xff]  ;;  %v1806_v28 = vld [vmem:[%s3640_s6 + $0x20] sm:$0xff] }
 0x3c4   : > { %v2571_v35 = vpop.eup %2570  ;;  %1476 = vmatprep.subr.bf16.mxu1 %v1445_v15  ;;  %2576 = vrcp.f32 %v1297_v8  ;;  %v510_v8 = vld [vmem:[%s3638_s4 + $0x30] sm:$0xff] }
 0x3c5   : > { %v1395_v55 = vmul.f32 %v2571_v35, %v3162_v42  ;;  %v1394_v26 = vmul.f32 %v2571_v35, %v3727_v18  ;;  %v1813_v42 = vld [vmem:[%s3640_s6 + $0x58] sm:$0xff]  ;;  %v1804_v35 = vld [vmem:[%s3640_s6 + $0x10] sm:$0xff] }
 0x3c6   : > { %v2573_v48 = vpop.eup %2572  ;;  %1846 = vperm.xlu0 %2371, %v1807_v37   ;;  %v1802_v37 = vld [vmem:[%s3640_s6] sm:$0xff]  ;;  %v2384_v18 = vld [vmem:[%s3641_s7 + $0x58] sm:$0xff]  }
 0x3c7   : > { %v1397_v46 = vmul.f32 %v2573_v48, %v3725_v38  ;;  %v1396_v60 = vmul.f32 %v2573_v48, %v3726_v16  ;;  %v1808_v48 = vld [vmem:[%s3640_s6 + $0x30] sm:$0xff]  ;;  %v2380_v16 = vld [vmem:[%s3641_s7 + $0x48] sm:$0xff]  }
 0x3c8   : > { %1477 = vmatpush1.bf16.xpose.msra.mxu1 %v1444_v62  ;;  %v1810_v62 = vld [vmem:[%s3640_s6 + $0x40] sm:$0xff]  ;;  %v1816_v38 = vld [vmem:[%s3640_s6 + $0x70] sm:$0xff] }
 0x3c9   : > { %v1447_v1 = vpack.c.bf16 %v1397_v46, %v1395_v55  ;;  %v1446_v45 = vpack.c.bf16 %v1396_v60, %v1394_v26  ;;  %v1814_v55 = vld [vmem:[%s3640_s6 + $0x60] sm:$0xff]  ;;  %v2381_v60 = vld [vmem:[%s3641_s7 + $0x8] sm:$0xff]  }
 0x3ca   : > { %1856 = vperm.xlu0 %2371, %v1809_v24   ;;  %v1812_v24 = vld [vmem:[%s3640_s6 + $0x50] sm:$0xff]  ;;  %v2378_v46 = vld [vmem:[%s3641_s7 + $0x40] sm:$0xff]  }
 0x3cb   : > { %1478 = vmatprep.subr.bf16.mxu1 %v1447_v1  ;;  %v2379_v1 = vld [vmem:[%s3641_s7] sm:$0xff]   ;;  %2278 = vmatprep.subr.bf16.mxu0 %v2378_v46  ;;  %v1303_v26 = vpop.xlane.xlu1 %1302 }
 0x3cc   : > { %v2575_v57 = vpop.eup %2574  ;;  %2279 = vmatpush3.bf16.msra.mxu0 %v2379_v1  ;;  %2578 = vrcp.f32 %v1303_v26 }
 0x3cd   : > { %v1399_v33 = vmul.f32 %v2575_v57, %v3728_v11  ;;  %v1398_v17 = vmul.f32 %v2575_v57, %v3731_v39  ;;  %2280 = vmatprep.subr.bf16.mxu0 %v2380_v16  ;;  %v2383_v57 = vld [vmem:[%s3641_s7 + $0x10] sm:$0xff]   ;;  %v2388_v11 = vld [vmem:[%s3641_s7 + $0x68] sm:$0xff]  }
 0x3ce   : > { %v2577_v41 = vpop.eup %2576  ;;  %1866 = vperm.xlu0 %2371, %v1811_v44   ;;  %v2382_v44 = vld [vmem:[%s3641_s7 + $0x50] sm:$0xff]  }
 0x3cf   : > { %v1401_v31 = vmul.f32 %v2577_v41, %v3729_v4  ;;  %v1400_v19 = vmul.f32 %v2577_v41, %v3730_v61  ;;  %v2385_v41 = vld [vmem:[%s3641_s7 + $0x18] sm:$0xff]   ;;  %v2389_v4 = vld [vmem:[%s3641_s7 + $0x28] sm:$0xff]   ;;  %v2391_v61 = vld [vmem:[%s3641_s7 + $0x30] sm:$0xff]  }
 0x3d0   : > { %1479 = vmatpush1.bf16.xpose.msra.mxu1 %v1446_v45  ;;  %2281 = vmatpush3.bf16.msra.mxu0 %v2381_v60  ;;  %v2386_v45 = vld [vmem:[%s3641_s7 + $0x60] sm:$0xff]  }
 0x3d1   : > { %v1449_v9 = vpack.c.bf16 %v1401_v31, %v1399_v33  ;;  %v1448_v15 = vpack.c.bf16 %v1400_v19, %v1398_v17  ;;  %2282 = vmatprep.subr.bf16.mxu0 %v2382_v44  ;;  %v2390_v31 = vld [vmem:[%s3641_s7 + $0x70] sm:$0xff]  }
 0x3d2   : > { %1876 = vperm.xlu0 %2371, %v1813_v42   ;;  %524 = vperm.xlu1 %2372, %v506_v6   ;;  %v2387_v6 = vld [vmem:[%s3641_s7 + $0x20] sm:$0xff]  }
 0x3d3   : > { %1480 = vmatprep.subr.bf16.mxu1 %v1449_v9 }
 0x3d4   : > { %2283 = vmatpush3.bf16.msra.mxu0 %v2383_v57 }
 0x3d5   : > { %2284 = vmatprep.subr.bf16.mxu0 %v2384_v18 }
 0x3d6   : > { %1886 = vperm.xlu0 %2371, %v1815_v0   ;;  %534 = vperm.xlu1 %2372, %v508_v36   ;;  %v2579_v19 = vpop.eup %2578  ;;  %v2392_v0 = vld [vmem:[%s3641_s7 + $0x78] sm:$0xff]  }
 0x3d8   : > { %1481 = vmatpush1.bf16.xpose.msra.mxu1 %v1448_v15  ;;  %2285 = vmatpush3.bf16.msra.mxu0 %v2385_v41  ;;  %v3732_v15 = vld [vmem:[#allocation14_spill] sm:$0xff] }
 0x3d9   : > { %2286 = vmatprep.subr.bf16.mxu0 %v2386_v45 }
 0x3da   : > { %1896 = vperm.xlu0 %2371, %v1817_v59   ;;  %544 = vperm.xlu1 %2372, %v510_v8   ;;  %v1405_v59 = vmul.f32 %v2579_v19, %v3732_v15 }
 0x3dc   : > { %2287 = vmatpush3.bf16.msra.mxu0 %v2387_v6 }
 0x3dd   : > { %2288 = vmatprep.subr.bf16.mxu0 %v2388_v11 }
 0x3de   : > { %1821 = vperm.xlu1 %2372, %v1802_v37   ;;  %v3733_v37 = vld [vmem:[#allocation13_spill] sm:$0xff] }
 0x3e0   : > { %2289 = vmatpush3.bf16.msra.mxu0 %v2389_v4 }
 0x3e1   : > { %2290 = vmatprep.subr.bf16.mxu0 %v2390_v31 }
 0x3e2   : > { %1831 = vperm.xlu1 %2372, %v1804_v35   ;;  %v1404_v35 = vmul.f32 %v2579_v19, %v3733_v37 }
 0x3e4   : > { %2291 = vmatpush3.bf16.msra.mxu0 %v2391_v61 }
 0x3e5   : > { %2292 = vmatprep.subr.bf16.mxu0 %v2392_v0 }
 0x3e6   : > { %1841 = vperm.xlu1 %2372, %v1806_v28  }
 0x3ea   : > { %1851 = vperm.xlu1 %2372, %v1808_v48  }
 0x3ee   : > { %1861 = vperm.xlu1 %2372, %v1810_v62  }
 0x3f2   : > { %1871 = vperm.xlu1 %2372, %v1812_v24  }
 0x3f6   : > { %1881 = vperm.xlu1 %2372, %v1814_v55  }
 0x3fa   : > { %1891 = vperm.xlu1 %2372, %v1816_v38  }
 0x40d   : > { %v1300_v42 = vpop.xlane.xlu0 %1299 }
 0x40e   : > { %2580 = vrcp.f32 %v1300_v42 }
 0x40f   : > { %v1309_v33 = vpop.xlane.xlu1 %1308 }
 0x410   : > { %2582 = vrcp.f32 %v1309_v33 }
 0x415   : > { %v1306_v9 = vpop.xlane.xlu0 %1305 }
 0x416   : > { %2584 = vrcp.f32 %v1306_v9 }
 0x418   : > { %v2581_v36 = vpop.eup %2580 }
 0x419   : > { %v1315_v39 = vpop.xlane.xlu1 %1314  ;;  %v1403_v17 = vmul.f32 %v2581_v36, %v3206_v52  ;;  %v1402_v8 = vmul.f32 %v2581_v36, %v3204_v2 }
 0x41a   : > { %2586 = vrcp.f32 %v1315_v39  ;;  %v2583_v24 = vpop.eup %2582 }
 0x41b   : > { %v1451_v28 = vpack.c.bf16 %v1405_v59, %v1403_v17  ;;  %v1450_v48 = vpack.c.bf16 %v1404_v35, %v1402_v8  ;;  %v1409_v52 = vmul.f32 %v2583_v24, %v3214_v63  ;;  %v1408_v2 = vmul.f32 %v2583_v24, %v3208_v30 }
 0x41d   : > { %v1312_v62 = vpop.xlane.xlu0 %1311  ;;  %1482 = vmatprep.subr.bf16.mxu1 %v1451_v28  ;;  %v520_v63 = vpop.permute.xlu1 %519 }
 0x41e   : > { %2588 = vrcp.f32 %v1312_v62  ;;  %1483 = vmatpush1.bf16.xpose.msra.mxu1 %v1450_v48  ;;  %v623_v30 = vadd.f32 %v3269_v29, %v520_v63  ;;  %v625_v6 = vadd.f32 %v3271_v23, %v520_v63 }
 0x420   : > { %v2585_v55 = vpop.eup %2584 }
 0x421   : > { %v1407_v38 = vmul.f32 %v2585_v55, %v3226_v20  ;;  %v1406_v46 = vmul.f32 %v2585_v55, %v3224_v51 }
 0x423   : > { %v1453_v1 = vpack.c.bf16 %v1409_v52, %v1407_v38  ;;  %v1452_v16 = vpack.c.bf16 %v1408_v2, %v1406_v46  ;;  %v2595_v2 = vld [vmem:[%s2705_s27 + $0x8] sm:$0xff] }
 0x424   : > { %v2587_v60 = vpop.eup %2586 }
 0x425   : > { %1484 = vmatprep.subr.bf16.mxu1 %v1453_v1  ;;  %v1318_v57 = vpop.xlane.xlu0 %1317  ;;  %v1413_v26 = vmul.f32 %v2587_v60, %v3234_v50  ;;  %v1412_v20 = vmul.f32 %v2587_v60, %v3232_v3  ;;  %v2596_v60 = vld [vmem:[%s2705_s27 + $0x10] sm:$0xff] }
 0x426   : > { %1485 = vmatpush1.bf16.xpose.msra.mxu1 %v1452_v16  ;;  %2590 = vrcp.f32 %v1318_v57  ;;  %v2597_v57 = vld [vmem:[%s2705_s27 + $0x18] sm:$0xff] }
 0x428   : > { %v2589_v44 = vpop.eup %2588 }
 0x429   : > { %v1411_v18 = vmul.f32 %v2589_v44, %v3244_v49  ;;  %v1410_v41 = vmul.f32 %v2589_v44, %v3242_v14 }
 0x42b   : > { %v1455_v45 = vpack.c.bf16 %v1413_v26, %v1411_v18  ;;  %v1454_v51 = vpack.c.bf16 %v1412_v20, %v1410_v41 }
 0x42d   : > { %v515_v42 = vpop.permute.xlu0 %514  ;;  %1486 = vmatprep.subr.bf16.mxu1 %v1455_v45 }
 0x42e   : > { %v619_v11 = vadd.f32 %v3265_v22, %v515_v42  ;;  %v621_v33 = vadd.f32 %v3267_v53, %v515_v42  ;;  %1487 = vmatpush1.bf16.xpose.msra.mxu1 %v1454_v51 }
 0x430   : > { %v1418_v49 = vpack.c.bf16 %v623_v30, %v619_v11  ;;  %v1419_v50 = vpack.c.bf16 %v625_v6, %v621_v33  ;;  %v2591_v0 = vpop.eup %2590  ;;  %v2598_v30 = vld [vmem:[%s2705_s27 + $0x20] sm:$0xff] }
 0x431   : > { %v530_v14 = vpop.permute.xlu0 %529  ;;  %v1414_v35 = vmul.f32 %v2591_v0, %v3252_v32  ;;  %v2393_v32 = vld [vmem:[%s3641_s7 + $0x38] sm:$0xff]  }
 0x432   : > { %1490 = vmatprep.mubr.bf16.mxu1 %v1419_v50  ;;  %v633_v9 = vadd.f32 %v3298_v13, %v530_v14  ;;  %v635_v29 = vadd.f32 %v3303_v40, %v530_v14  ;;  %2293 = vmatpush3.bf16.msra.mxu0 %v2393_v32 }
 0x435   : > { %v540_v4 = vpop.permute.xlu0 %539 }
 0x436   : > { %v643_v36 = vadd.f32 %v3310_v21, %v540_v4  ;;  %v645_v39 = vadd.f32 %v3315_v5, %v540_v4 }
 0x439   : > { %v550_v59 = vpop.permute.xlu0 %549 }
 0x43a   : > { %v653_v21 = vadd.f32 %v3324_v34, %v550_v59  ;;  %v655_v5 = vadd.f32 %v3331_v56, %v550_v59  ;;  %v2603_v59 = vld [vmem:[%s2705_s27 + $0x48] sm:$0xff] }
 0x44e   : > { %v1321_v3 = vpop.xlane.xlu1 %1320 }
 0x44f   : > { %2592 = vrcp.f32 %v1321_v3  ;;  %v2600_v3 = vld [vmem:[%s2705_s27 + $0x30] sm:$0xff] }
 0x452   : > { %v525_v31 = vpop.permute.xlu1 %524 }
 0x453   : > { %v629_v23 = vadd.f32 %v3293_v12, %v525_v31  ;;  %v631_v22 = vadd.f32 %v3295_v10, %v525_v31  ;;  %v1415_v12 = vmul.f32 %v2591_v0, %v3254_v47  ;;  %v3484_v47 = vstv %s1531_s14  ;;  %v2601_v31 = vld [vmem:[%s2705_s27 + $0x38] sm:$0xff] }
 0x455   : > { %v1420_v61 = vpack.c.bf16 %v633_v9, %v629_v23  ;;  %v1421_v53 = vpack.c.bf16 %v635_v29, %v631_v22 }
 0x456   : > { %v535_v19 = vpop.permute.xlu1 %534 }
 0x457   : > { %v639_v17 = vadd.f32 %v3306_v25, %v535_v19  ;;  %v641_v15 = vadd.f32 %v3308_v7, %v535_v19 }
 0x459   : > { %v2593_v13 = vpop.eup %2592  ;;  %v1422_v8 = vpack.c.bf16 %v643_v36, %v639_v17  ;;  %v1423_v40 = vpack.c.bf16 %v645_v39, %v641_v15  ;;  %v2602_v36 = vld [vmem:[%s2705_s27 + $0x40] sm:$0xff] }
 0x45a   : > { %v545_v37 = vpop.permute.xlu1 %544  ;;  %v1417_v10 = vmul.f32 %v2593_v13, %v3333_v58  ;;  %v1416_v28 = vmul.f32 %v2593_v13, %v3326_v43  ;;  %v2594_v58 = vld [vmem:[%s2705_s27] sm:$0xff] }
 0x45b   : > { %v649_v25 = vadd.f32 %v3319_v54, %v545_v37  ;;  %v651_v7 = vadd.f32 %v3321_v27, %v545_v37 }
 0x45c   : > { %v1457_v48 = vpack.c.bf16 %v1417_v10, %v1415_v12  ;;  %v1456_v62 = vpack.c.bf16 %v1416_v28, %v1414_v35  ;;  %v2605_v12 = vld [vmem:[%s2705_s27 + $0x58] sm:$0xff] }
 0x45d   : > { %v1424_v24 = vpack.c.bf16 %v653_v21, %v649_v25  ;;  %v1425_v55 = vpack.c.bf16 %v655_v5, %v651_v7 }
 0x45e   : > { %1488 = vmatprep.subr.bf16.mxu1 %v1457_v48 }
 0x45f   : > { %1489 = vmatpush1.bf16.xpose.msra.mxu1 %v1456_v62  ;;  %v2606_v62 = vld [vmem:[%s2705_s27 + $0x60] sm:$0xff] }
 0x466   : > { %1491 = vmatmul.mubr.bf16.vlgmr.msra.gmra.mrb[16].mxu1 %v1418_v49  ;;  %v2599_v49 = vld [vmem:[%s2705_s27 + $0x28] sm:$0xff] }
 0x467   : > { %1500 = vmatprep.mubr.bf16.mxu1 %v1421_v53 }
 0x46e   : > { %1501 = vmatmul.mubr.bf16.gmra.mrb[20].mxu1 %v1420_v61 }
 0x46f   : > { %1510 = vmatprep.mubr.bf16.mxu1 %v1423_v40  ;;  %v2604_v40 = vld [vmem:[%s2705_s27 + $0x50] sm:$0xff] }
 0x476   : > { %1511 = vmatmul.mubr.bf16.gmra.mrb[24].mxu1 %v1422_v8 }
 0x477   : > { %1520 = vmatprep.mubr.bf16.mxu1 %v1425_v55 }
 0x47e   : > { %1521 = vmatmul.mubr.bf16.gmra.mrb[28].mxu1 %v1424_v24 }
 0x539   : > { %v1492_v54 = vpop.f32.mrb[16].mxu1 }
 0x53a   : > { %v1533_v27 = vmul.f32 %v3484_v47, %v1492_v54  ;;  %v1494_v34 = vpop.f32.mrb[17].mxu1  ;;  %v2607_v54 = vld [vmem:[%s2705_s27 + $0x68] sm:$0xff] }
 0x53b   : > { %v1534_v43 = vmul.f32 %v3484_v47, %v1494_v34  ;;  %v1496_v56 = vpop.f32.mrb[18].mxu1 }
 0x53c   : > { %v1549_v38 = vadd.f32 %v2594_v58, %v1533_v27  ;;  %v1535_v52 = vmul.f32 %v3484_v47, %v1496_v56  ;;  %v1498_v46 = vpop.f32.mrb[19].mxu1  ;;  %v2609_v58 = vld [vmem:[%s2705_s27 + $0x78] sm:$0xff] }
 0x53d   : > { %v1550_v1 = vadd.f32 %v2595_v2, %v1534_v43  ;;  %v1536_v16 = vmul.f32 %v3484_v47, %v1498_v46  ;;  %v2608_v43 = vld [vmem:[%s2705_s27 + $0x70] sm:$0xff]  ;;  %v2394_v2 = vld [vmem:[%s3639_s5] sm:$0xff]  }
 0x53e   : > { %1565 = vst [vmem:[%s3491_s17] sm:$0xff] %v1549_v38  ;;  %v1551_v44 = vadd.f32 %v2596_v60, %v1535_v52 }
 0x53f   : > { %1566 = vst [vmem:[%s3491_s17 + $0x8] sm:$0xff] %v1550_v1  ;;  %v1552_v18 = vadd.f32 %v2597_v57, %v1536_v16 }
 0x540   : > { %1567 = vst [vmem:[%s3491_s17 + $0x10] sm:$0xff] %v1551_v44  ;;  %v1581_v26 = vpack.c.bf16 %v1551_v44, %v1549_v38 }
 0x541   : > { %1568 = vst [vmem:[%s3491_s17 + $0x18] sm:$0xff] %v1552_v18  ;;  %v1502_v41 = vpop.f32.mrb[20].mxu1  ;;  %v1582_v20 = vpack.c.bf16 %v1552_v18, %v1550_v1 }
 0x542   : > { %v1537_v63 = vmul.f32 %v3484_v47, %v1502_v41  ;;  %v1504_v45 = vpop.f32.mrb[21].mxu1 }
 0x543   : > { %v1538_v51 = vmul.f32 %v3484_v47, %v1504_v45  ;;  %v1506_v42 = vpop.f32.mrb[22].mxu1  ;;  %1749 = vmatprep.mubr.bf16.mxu0 %v1582_v20 }
 0x544   : > { %v1553_v6 = vadd.f32 %v2598_v30, %v1537_v63  ;;  %v1539_v11 = vmul.f32 %v3484_v47, %v1506_v42  ;;  %v1508_v33 = vpop.f32.mrb[23].mxu1  ;;  %1750 = vmatmul.mubr.bf16.vlgmr.msra.gmra.mrb[68].mxu0 %v1581_v26 }
 0x545   : > { %v1554_v50 = vadd.f32 %v2599_v49, %v1538_v51  ;;  %v1540_v14 = vmul.f32 %v3484_v47, %v1508_v33 }
 0x546   : > { %1569 = vst [vmem:[%s3491_s17 + $0x20] sm:$0xff] %v1553_v6  ;;  %v1555_v4 = vadd.f32 %v2600_v3, %v1539_v11 }
 0x547   : > { %1570 = vst [vmem:[%s3491_s17 + $0x28] sm:$0xff] %v1554_v50  ;;  %v1556_v9 = vadd.f32 %v2601_v31, %v1540_v14 }
 0x548   : > { %1571 = vst [vmem:[%s3491_s17 + $0x30] sm:$0xff] %v1555_v4  ;;  %v1583_v29 = vpack.c.bf16 %v1555_v4, %v1553_v6 }
 0x549   : > { %1572 = vst [vmem:[%s3491_s17 + $0x38] sm:$0xff] %v1556_v9  ;;  %v1512_v23 = vpop.f32.mrb[24].mxu1  ;;  %v1584_v22 = vpack.c.bf16 %v1556_v9, %v1554_v50 }
 0x54a   : > { %v1541_v61 = vmul.f32 %v3484_v47, %v1512_v23  ;;  %v1514_v53 = vpop.f32.mrb[25].mxu1 }
 0x54b   : > { %v1542_v19 = vmul.f32 %v3484_v47, %v1514_v53  ;;  %v1516_v0 = vpop.f32.mrb[26].mxu1  ;;  %1757 = vmatprep.mubr.bf16.mxu0 %v1584_v22  ;;  %v2396_v53 = vld [vmem:[%s3639_s5 + $0x8] sm:$0xff]  }
 0x54c   : > { %v1557_v39 = vadd.f32 %v2602_v36, %v1541_v61  ;;  %v1543_v17 = vmul.f32 %v3484_v47, %v1516_v0  ;;  %v1518_v15 = vpop.f32.mrb[27].mxu1  ;;  %1758 = vmatmul.mubr.bf16.gmra.mrb[72].mxu0 %v1583_v29  ;;  %v2398_v0 = vld [vmem:[%s3639_s5 + $0x20] sm:$0xff]   ;;  %v2399_v36 = vld [vmem:[%s3639_s5 + $0x28] sm:$0xff]  }
 0x54d   : > { %v1558_v13 = vadd.f32 %v2603_v59, %v1542_v19  ;;  %v1544_v8 = vmul.f32 %v3484_v47, %v1518_v15  ;;  %v2397_v19 = vld [vmem:[%s3639_s5 + $0x18] sm:$0xff]   ;;  %v1827_v15 = vpop.permute.xlu0 %1826  ;;  %v1822_v59 = vpop.permute.xlu1 %1821 }
 0x54e   : > { %1573 = vst [vmem:[%s3491_s17 + $0x40] sm:$0xff] %v1557_v39  ;;  %v1559_v37 = vadd.f32 %v2604_v40, %v1543_v17  ;;  %v2401_v17 = vld [vmem:[%s3639_s5 + $0x38] sm:$0xff]  }
 0x54f   : > { %1574 = vst [vmem:[%s3491_s17 + $0x48] sm:$0xff] %v1558_v13  ;;  %v1560_v10 = vadd.f32 %v2605_v12, %v1544_v8 }
 0x550   : > { %1575 = vst [vmem:[%s3491_s17 + $0x50] sm:$0xff] %v1559_v37  ;;  %v1585_v35 = vpack.c.bf16 %v1559_v37, %v1557_v39  ;;  %v2400_v39 = vld [vmem:[%s3639_s5 + $0x30] sm:$0xff]  }
 0x551   : > { %1576 = vst [vmem:[%s3491_s17 + $0x58] sm:$0xff] %v1560_v10  ;;  %v1522_v28 = vpop.f32.mrb[28].mxu1  ;;  %v1586_v21 = vpack.c.bf16 %v1560_v10, %v1558_v13  ;;  %v1837_v13 = vpop.permute.xlu0 %1836 }
 0x552   : > { %v1545_v5 = vmul.f32 %v3484_v47, %v1522_v28  ;;  %v1524_v25 = vpop.f32.mrb[29].mxu1  ;;  %v1832_v8 = vpop.permute.xlu1 %1831 }
 0x553   : > { %v1546_v7 = vmul.f32 %v3484_v47, %v1524_v25  ;;  %v1526_v48 = vpop.f32.mrb[30].mxu1  ;;  %1765 = vmatprep.mubr.bf16.mxu0 %v1586_v21  ;;  %v3575_v21 = vld [vmem:[%s3642_s8] ss:$0 sm:$0xff] }
 0x554   : > { %v1561_v24 = vadd.f32 %v2606_v62, %v1545_v5  ;;  %v1547_v55 = vmul.f32 %v3484_v47, %v1526_v48  ;;  %v1528_v32 = vpop.f32.mrb[31].mxu1  ;;  %1766 = vmatmul.mubr.bf16.gmra.mrb[76].mxu0 %v1585_v35  ;;  %v1907_v25 = vmul.f32 %v3575_v21, %v1832_v8  ;;  %v1905_v62 = vmul.f32 %v3575_v21, %v1822_v59 }
 0x555   : > { %v1562_v27 = vadd.f32 %v2607_v54, %v1546_v7  ;;  %v1548_v34 = vmul.f32 %v3484_v47, %v1528_v32  ;;  %v2395_v47 = vld [vmem:[%s3639_s5 + $0x10] sm:$0xff]   ;;  %v1847_v40 = vpop.permute.xlu0 %1846  ;;  %v1908_v54 = vmul.f32 %v3575_v21, %v1837_v13 }
 0x556   : > { %1577 = vst [vmem:[%s3491_s17 + $0x60] sm:$0xff] %v1561_v24  ;;  %v1563_v56 = vadd.f32 %v2608_v43, %v1547_v55  ;;  %2342 = vmatprep.mubr.msk.bf16.mxu1 %vm445_vm0, %v2395_v47  ;;  %v1842_v37 = vpop.permute.xlu1 %1841 }
 0x557   : > { %1578 = vst [vmem:[%s3491_s17 + $0x68] sm:$0xff] %v1562_v27  ;;  %v1564_v38 = vadd.f32 %v2609_v58, %v1548_v34 }
 0x558   : > { %1579 = vst [vmem:[%s3491_s17 + $0x70] sm:$0xff] %v1563_v56  ;;  %v1587_v52 = vpack.c.bf16 %v1563_v56, %v1561_v24  ;;  %v1909_v24 = vmul.f32 %v3575_v21, %v1842_v37 }
 0x559   : > { %1580 = vst [vmem:[%s3491_s17 + $0x78] sm:$0xff] %v1564_v38  ;;  %v1588_v46 = vpack.c.bf16 %v1564_v38, %v1562_v27  ;;  %v1857_v12 = vpop.permute.xlu0 %1856  ;;  %v1906_v38 = vmul.f32 %v3575_v21, %v1827_v15 }
 0x55a   : > { %v1852_v10 = vpop.permute.xlu1 %1851  ;;  %v1912_v27 = vmul.f32 %v3575_v21, %v1857_v12 }
 0x55b   : > { %1773 = vmatprep.mubr.bf16.mxu0 %v1588_v46  ;;  %v1911_v7 = vmul.f32 %v3575_v21, %v1852_v10 }
 0x55c   : > { %1774 = vmatmul.mubr.bf16.gmra.mrb[80].mxu0 %v1587_v52  ;;  %v1910_v52 = vmul.f32 %v3575_v21, %v1847_v40 }
 0x55d   : > { %2338 = vmatprep.mubr.msk.bf16.mxu0 %vm445_vm0, %v2394_v2  ;;  %v1867_v35 = vpop.permute.xlu0 %1866 }
 0x55e   : > { %v1862_v28 = vpop.permute.xlu1 %1861 }
 0x561   : > { %v1877_v5 = vpop.permute.xlu0 %1876 }
 0x562   : > { %v1872_v48 = vpop.permute.xlu1 %1871 }
 0x617   : > { %v2294_v1 = vpop.f32.mrb[68].mxu0 }
 0x618   : > { %v2295_v16 = vpop.f32.mrb[69].mxu0 }
 0x619   : > { %v2296_v60 = vadd.f32 %v2295_v16, %v2294_v1  ;;  %v2297_v44 = vpop.f32.mrb[70].mxu0 }
 0x61a   : > { %v2298_v57 = vpop.f32.mrb[71].mxu0 }
 0x61b   : > { %v2299_v18 = vadd.f32 %v2298_v57, %v2297_v44 }
 0x61d   : > { %v1798_v26 = vpack.c.bf16 %v2299_v18, %v2296_v60 }
 0x61f   : > { %v2300_v41 = vpop.f32.mrb[72].mxu0  ;;  %2330 = vmatprep.subr.bf16.mxu0 %v1798_v26  ;;  %2354 = vmatprep.subr.bf16.mxu1 %v1798_v26 }
 0x620   : > { %v2301_v20 = vpop.f32.mrb[73].mxu0  ;;  %2331 = vmatpush3.bf16.msra.mxu0 %v1798_v26  ;;  %2358 = vmatpush3.bf16.msra.mxu1 %v1798_v26 }
 0x621   : > { %v2302_v63 = vadd.f32 %v2301_v20, %v2300_v41  ;;  %v2303_v45 = vpop.f32.mrb[74].mxu0 }
 0x622   : > { %v2304_v51 = vpop.f32.mrb[75].mxu0 }
 0x623   : > { %v2305_v42 = vadd.f32 %v2304_v51, %v2303_v45 }
 0x625   : > { %v1799_v30 = vpack.c.bf16 %v2305_v42, %v2302_v63 }
 0x627   : > { %v2306_v6 = vpop.f32.mrb[76].mxu0  ;;  %2332 = vmatprep.subr.bf16.mxu0 %v1799_v30  ;;  %2355 = vmatprep.subr.bf16.mxu1 %v1799_v30 }
 0x628   : > { %v2307_v11 = vpop.f32.mrb[77].mxu0  ;;  %2333 = vmatpush3.bf16.msra.mxu0 %v1799_v30  ;;  %2359 = vmatpush3.bf16.msra.mxu1 %v1799_v30  ;;  %v1882_v30 = vpop.permute.xlu1 %1881 }
 0x629   : > { %v2308_v33 = vadd.f32 %v2307_v11, %v2306_v6  ;;  %v2309_v49 = vpop.f32.mrb[78].mxu0  ;;  %v1917_v13 = vmul.f32 %v3575_v21, %v1882_v30 }
 0x62a   : > { %v2310_v50 = vpop.f32.mrb[79].mxu0 }
 0x62b   : > { %v2311_v14 = vadd.f32 %v2310_v50, %v2309_v49  ;;  %v1887_v49 = vpop.permute.xlu0 %1886  ;;  %v1913_v50 = vmul.f32 %v3575_v21, %v1862_v28 }
 0x62c   : > { %v1918_v10 = vmul.f32 %v3575_v21, %v1887_v49 }
 0x62d   : > { %v1800_v3 = vpack.c.bf16 %v2311_v14, %v2308_v33  ;;  %v1915_v33 = vmul.f32 %v3575_v21, %v1872_v48 }
 0x62f   : > { %v2312_v4 = vpop.f32.mrb[80].mxu0  ;;  %2334 = vmatprep.subr.bf16.mxu0 %v1800_v3  ;;  %2356 = vmatprep.subr.bf16.mxu1 %v1800_v3 }
 0x630   : > { %v2313_v31 = vpop.f32.mrb[81].mxu0  ;;  %2335 = vmatpush3.bf16.msra.mxu0 %v1800_v3  ;;  %2360 = vmatpush3.bf16.msra.mxu1 %v1800_v3  ;;  %v1916_v3 = vmul.f32 %v3575_v21, %v1877_v5 }
 0x631   : > { %v2314_v9 = vadd.f32 %v2313_v31, %v2312_v4  ;;  %v2315_v29 = vpop.f32.mrb[82].mxu0 }
 0x632   : > { %v2316_v23 = vpop.f32.mrb[83].mxu0 }
 0x633   : > { %v2317_v22 = vadd.f32 %v2316_v23, %v2315_v29 }
 0x635   : > { %v1801_v61 = vpack.c.bf16 %v2317_v22, %v2314_v9  ;;  %v1914_v9 = vmul.f32 %v3575_v21, %v1867_v35 }
 0x637   : > { %2336 = vmatprep.subr.bf16.mxu0 %v1801_v61  ;;  %2357 = vmatprep.subr.bf16.mxu1 %v1801_v61 }
 0x638   : > { %2337 = vmatpush3.bf16.msra.mxu0 %v1801_v61  ;;  %2361 = vmatpush3.bf16.msra.mxu1 %v1801_v61 }
 0x63b   : > { %2339 = vmatmul.mubr.msk.bf16.vlgmr.msra.gmra.mrb[84].mxu0 %vm445_vm0, %v2396_v53  ;;  %2343 = vmatmul.mubr.msk.bf16.vlgmr.msra.gmra.mrb[32].mxu1 %vm445_vm0, %v2397_v19  ;;  %v1892_v19 = vpop.permute.xlu1 %1891 }
 0x63c   : > { %2346 = vmatprep.mubr.msk.bf16.mxu1 %vm445_vm0, %v2398_v0  ;;  %v1919_v59 = vmul.f32 %v3575_v21, %v1892_v19 }
 0x643   : > { %2347 = vmatmul.mubr.msk.bf16.gmra.mrb[36].mxu1 %vm445_vm0, %v2399_v36 }
 0x644   : > { %2350 = vmatprep.mubr.msk.bf16.mxu1 %vm445_vm0, %v2400_v39 }
 0x64b   : > { %2351 = vmatmul.mubr.msk.bf16.gmra.mrb[40].mxu1 %vm445_vm0, %v2401_v17  ;;  %v1897_v17 = vpop.permute.xlu0 %1896 }
 0x64c   : > { %v1920_v40 = vmul.f32 %v3575_v21, %v1897_v17 }
 0x70e   : > { %v2340_v55 = vpop.f32.mrb[84].mxu0  ;;  %v2344_v32 = vpop.f32.mrb[32].mxu1 }
 0x70f   : > { %v2028_v34 = vadd.f32 %v2340_v55, %v1907_v25  ;;  %v2044_v43 = vadd.f32 %v2344_v32, %v1911_v7  ;;  %v2019_v56 = vpop.f32.mrb[85].mxu0  ;;  %v2035_v58 = vpop.f32.mrb[33].mxu1 }
 0x710   : > { %v2020_v46 = vadd.f32 %v2019_v56, %v1905_v62  ;;  %v2036_v2 = vadd.f32 %v2035_v58, %v1909_v24  ;;  %v2341_v47 = vpop.f32.mrb[86].mxu0  ;;  %v2345_v1 = vpop.f32.mrb[34].mxu1 }
 0x711   : > { %v2084_v16 = vmul.f32 0.11111111, %v2028_v34  ;;  %v2088_v60 = vmul.f32 0.11111111, %v2044_v43  ;;  %v2031_v44 = vadd.f32 %v2341_v47, %v1908_v54  ;;  %v2047_v57 = vadd.f32 %v2345_v1, %v1912_v27  ;;  %v2022_v18 = vpop.f32.mrb[87].mxu0  ;;  %v2038_v26 = vpop.f32.mrb[35].mxu1 }
 0x712   : > { %v2082_v41 = vmul.f32 0.11111111, %v2020_v46  ;;  %v2086_v20 = vmul.f32 0.11111111, %v2036_v2  ;;  %v2023_v63 = vadd.f32 %v2022_v18, %v1906_v38  ;;  %v2039_v45 = vadd.f32 %v2038_v26, %v1910_v52 }
 0x713   : > { %2100 = vst.msk [vmem:[%s3589_s9 + $0x10] sm:$0xff] %vm445_vm0, %v2084_v16  ;;  %2104 = vst.msk [vmem:[%s3589_s9 + $0x30] sm:$0xff] %vm445_vm0, %v2088_v60  ;;  %v2085_v51 = vmul.f32 0.11111111, %v2031_v44  ;;  %v2089_v42 = vmul.f32 0.11111111, %v2047_v57 }
 0x714   : > { %2098 = vst.msk [vmem:[%s3589_s9] sm:$0xff] %vm445_vm0, %v2082_v41  ;;  %2102 = vst.msk [vmem:[%s3589_s9 + $0x20] sm:$0xff] %vm445_vm0, %v2086_v20  ;;  %v2083_v6 = vmul.f32 0.11111111, %v2023_v63  ;;  %v2087_v11 = vmul.f32 0.11111111, %v2039_v45 }
 0x715   : > { %2101 = vst.msk [vmem:[%s3589_s9 + $0x18] sm:$0xff] %vm445_vm0, %v2085_v51  ;;  %2105 = vst.msk [vmem:[%s3589_s9 + $0x38] sm:$0xff] %vm445_vm0, %v2089_v42 }
 0x716   : > { %2099 = vst.msk [vmem:[%s3589_s9 + $0x8] sm:$0xff] %vm445_vm0, %v2083_v6  ;;  %2103 = vst.msk [vmem:[%s3589_s9 + $0x28] sm:$0xff] %vm445_vm0, %v2087_v11  ;;  %v2348_v14 = vpop.f32.mrb[36].mxu1 }
 0x717   : > { %v2060_v4 = vadd.f32 %v2348_v14, %v1915_v33  ;;  %v2051_v31 = vpop.f32.mrb[37].mxu1 }
 0x718   : > { %v2052_v29 = vadd.f32 %v2051_v31, %v1913_v50  ;;  %v2349_v23 = vpop.f32.mrb[38].mxu1 }
 0x719   : > { %v2092_v22 = vmul.f32 0.11111111, %v2060_v4  ;;  %v2063_v61 = vadd.f32 %v2349_v23, %v1916_v3  ;;  %v2054_v53 = vpop.f32.mrb[39].mxu1 }
 0x71a   : > { %v2090_v0 = vmul.f32 0.11111111, %v2052_v29  ;;  %v2055_v36 = vadd.f32 %v2054_v53, %v1914_v9 }
 0x71b   : > { %2108 = vst.msk [vmem:[%s3589_s9 + $0x50] sm:$0xff] %vm445_vm0, %v2092_v22  ;;  %v2093_v39 = vmul.f32 0.11111111, %v2063_v61 }
 0x71c   : > { %2106 = vst.msk [vmem:[%s3589_s9 + $0x40] sm:$0xff] %vm445_vm0, %v2090_v0  ;;  %v2091_v15 = vmul.f32 0.11111111, %v2055_v36 }
 0x71d   : > { %2109 = vst.msk [vmem:[%s3589_s9 + $0x58] sm:$0xff] %vm445_vm0, %v2093_v39 }
 0x71e   : > { %2107 = vst.msk [vmem:[%s3589_s9 + $0x48] sm:$0xff] %vm445_vm0, %v2091_v15  ;;  %v2352_v8 = vpop.f32.mrb[40].mxu1 }
 0x71f   : > { %v2076_v37 = vadd.f32 %v2352_v8, %v1919_v59  ;;  %v2067_v12 = vpop.f32.mrb[41].mxu1 }
 0x720   : > { %v2068_v35 = vadd.f32 %v2067_v12, %v1917_v13  ;;  %v2353_v28 = vpop.f32.mrb[42].mxu1 }
 0x721   : > { %v2096_v5 = vmul.f32 0.11111111, %v2076_v37  ;;  %v2079_v25 = vadd.f32 %v2353_v28, %v1920_v40  ;;  %v2070_v7 = vpop.f32.mrb[43].mxu1 }
 0x722   : > { %v2094_v48 = vmul.f32 0.11111111, %v2068_v35  ;;  %v2071_v62 = vadd.f32 %v2070_v7, %v1918_v10 }
 0x723   : > { %2112 = vst.msk [vmem:[%s3589_s9 + $0x70] sm:$0xff] %vm445_vm0, %v2096_v5  ;;  %v2097_v24 = vmul.f32 0.11111111, %v2079_v25 }
 0x724   : > { %2110 = vst.msk [vmem:[%s3589_s9 + $0x60] sm:$0xff] %vm445_vm0, %v2094_v48  ;;  %v2095_v55 = vmul.f32 0.11111111, %v2071_v62 }
 0x725   : > { %2113 = vst.msk [vmem:[%s3589_s9 + $0x78] sm:$0xff] %vm445_vm0, %v2097_v24 }
 0x726   : > { %2111 = vst.msk [vmem:[%s3589_s9 + $0x68] sm:$0xff] %vm445_vm0, %v2095_v55 }
 0x727 PF: > { %s23_s19 = sadd.s32 1, %s2616_s19  }
 0x728   : > { %p20_p4 = scmp.ge.s32.totalorder %s23_s19, 4  }
 0x72a   :  { %22 = sbr.rel (!%p20_p4) target bundleno = 2 (0x2), region = 102 }

</bundles_post_ra>
